<compile_context>
chip_gen: v7x
topology: tpu7x:2x2x1
jax: 0.10.0
libtpu: 0.0.40
codegen_flags: <defaults>
</compile_context>

<pallas_src>
import functools
import math

import jax
import jax.numpy as jnp
from jax.experimental import pallas as pl
from jax.experimental.pallas import tpu as pltpu


# ---------------- small synthetic config (mirrors SiglipVisionConfig) ----------------
class Config:
    hidden_size = 128            # lane-dense (multiple of 128)
    intermediate_size = 256      # lane-dense
    num_hidden_layers = 2
    num_attention_heads = 2      # head_dim = 64
    num_channels = 3
    image_size = 32
    patch_size = 8               # -> 16 patches
    layer_norm_eps = 1e-6


# ---------------- in-kernel helpers ----------------
def _layernorm(x, g, b, eps):
    mu = jnp.mean(x, axis=-1, keepdims=True)
    var = jnp.mean(jnp.square(x - mu), axis=-1, keepdims=True)
    return (x - mu) * jax.lax.rsqrt(var + eps) * g + b


def _gelu_tanh(x):
    c = math.sqrt(2.0 / math.pi)
    return 0.5 * x * (1.0 + jnp.tanh(c * (x + 0.044715 * x * x * x)))


# ---------------- fused Pallas kernel ----------------
def siglip_fused_kernel(patch_ref, pw_ref, pb_ref, pos_ref,
                        ln1g_ref, ln1b_ref, wqkv_ref, bqkv_ref,
                        wo_ref, bo_ref, ln2g_ref, ln2b_ref,
                        w1_ref, b1_ref, w2_ref, b2_ref,
                        postg_ref, postb_ref,
                        out_ref, ctx_ref, *, num_heads, head_dim, eps):
    layer = pl.program_id(1)
    n_layers = pl.num_programs(1)
    Bb, N, D = out_ref.shape
    M = Bb * N
    CPP = patch_ref.shape[-1]

    # ---- prologue (layer 0): patch embedding + positional embedding ----
    @pl.when(layer == 0)
    def _():
        p = patch_ref[...].reshape(M, CPP)                     # already bf16
        emb = jnp.dot(p, pw_ref[...], preferred_element_type=jnp.float32)
        emb = emb.reshape(Bb, N, D) + pb_ref[...] + pos_ref[...]
        out_ref[...] = emb

    # NOTE: the activation is carried across the layer grid axis via the
    # resident output block.  This is correct only because out_specs'
    # index_map is constant in `l` (block stays in VMEM across layers) and the
    # layer-0 prologue above fully overwrites the block.  Do not change the
    # out_specs index_map or grid order without revisiting this.
    x = out_ref[...].reshape(M, D)                             # f32

    # ---- self-attention block ----
    h = _layernorm(x, ln1g_ref[0], ln1b_ref[0], eps).astype(jnp.bfloat16)
    # Q scale (head_dim**-0.5) is folded into the Q columns of wqkv/bqkv.
    qkv = (jnp.dot(h, wqkv_ref[0], preferred_element_type=jnp.float32)
           + bqkv_ref[0]).astype(jnp.bfloat16)

    # Per-head scores/softmax/context; each head's context is stored into the
    # (M, D) VMEM scratch at its lane offset, so the output projection below is
    # a single K=D matmul instead of H small K=head_dim matmuls.
    # (For real head counts of 12-16, replace this short static loop with a
    #  batched dot_general / lax.fori_loop to bound vreg live ranges.)
    for hh in range(num_heads):
        lo = hh * head_dim
        q_h = qkv[:, lo:lo + head_dim].reshape(Bb, N, head_dim)
        k_h = qkv[:, D + lo:D + lo + head_dim].reshape(Bb, N, head_dim)
        v_h = qkv[:, 2 * D + lo:2 * D + lo + head_dim].reshape(Bb, N, head_dim)

        s = jnp.einsum('bqd,bkd->bqk', q_h, k_h,
                       preferred_element_type=jnp.float32)     # (Bb, N, N)
        s = s - jnp.max(s, axis=-1, keepdims=True)
        p = jnp.exp(s)
        p = p * pl.reciprocal(jnp.sum(p, axis=-1, keepdims=True), approx=True)
        c = jnp.einsum('bqk,bkd->bqd', p.astype(jnp.bfloat16), v_h,
                       preferred_element_type=jnp.float32)     # (Bb, N, hd)
        ctx_ref[:, lo:lo + head_dim] = c.reshape(M, head_dim).astype(jnp.bfloat16)

    attn = jnp.dot(ctx_ref[...], wo_ref[0],
                   preferred_element_type=jnp.float32) + bo_ref[0]
    x = x + attn

    # ---- MLP block ----
    h2 = _layernorm(x, ln2g_ref[0], ln2b_ref[0], eps).astype(jnp.bfloat16)
    m = jnp.dot(h2, w1_ref[0], preferred_element_type=jnp.float32) + b1_ref[0]
    m = _gelu_tanh(m).astype(jnp.bfloat16)
    m = jnp.dot(m, w2_ref[0], preferred_element_type=jnp.float32) + b2_ref[0]
    x = x + m

    # ---- carry / epilogue (post-layernorm on the last layer) ----
    @pl.when(layer < n_layers - 1)
    def _():
        out_ref[...] = x.reshape(Bb, N, D)

    @pl.when(layer == n_layers - 1)
    def _():
        y = _layernorm(x, postg_ref[...], postb_ref[...], eps)
        out_ref[...] = y.reshape(Bb, N, D)


# ---------------- glue: patch extraction (non-overlapping conv == matmul) ----------------
def extract_patches(pixel_values, patch_size):
    # pixel_values: (B, C, H, W) NCHW, stride == kernel == patch_size, valid padding
    B, C, H, W = pixel_values.shape
    P = patch_size
    x = pixel_values.reshape(B, C, H // P, P, W // P, P)
    x = x.transpose(0, 2, 4, 1, 3, 5)                      # (B, Hp, Wp, C, P, P)
    return x.reshape(B, (H // P) * (W // P), C * P * P)


def _pick_batch_block(batch, n_tokens, target_rows=512):
    # Cap bb at batch//2 so the "parallel" batch grid axis has extent >= 2 and
    # both v7x TensorCores get work (a no-op on v5e/v6e which have one TC).
    # target_rows: 512 fills the 256-row MXU side on v6e/v7x; on v5e 128-256 is
    # already enough (4x128^2 MXU) if VMEM is tight.
    max_bb = max(1, batch // 2) if batch >= 2 else 1
    bb = max(1, min(max_bb, target_rows // max(1, n_tokens)))
    while batch % bb:
        bb -= 1
    return bb


def _vmem_limit_bytes():
    # ~3/4 of physical VMEM (capped at 100 MiB) so the per-layer weight stack
    # keeps double-buffering instead of silently de-pipelining:
    #   v5e/v6e (128 MiB physical) -> ~96-100 MiB;  v7x (64 MiB) -> ~48 MiB.
    try:
        cap = pltpu.get_tpu_info().vmem_capacity_bytes
    except Exception:
        cap = 128 << 20
    return int(min(cap * 3 // 4, 100 << 20))


def _nbytes(a):
    return int(a.size) * a.dtype.itemsize


def _cost_estimate(B, N, CPP, D, I, L, H, nb, patches, const_args, stacked_args,
                   out_nbytes):
    M = B * N
    hd = D // H
    flops = 2 * M * CPP * D
    flops += L * (2 * M * D * 3 * D          # qkv projection
                  + 4 * B * H * N * N * hd   # scores + context
                  + 2 * M * D * D            # out projection
                  + 4 * M * D * I)           # mlp fc1 + fc2
    transcend = L * (B * H * N * N + M * I)  # exp + tanh
    # Layer-stacked weights are re-DMA'd once per batch block (nb times total).
    bytes_accessed = (_nbytes(patches)
                      + sum(_nbytes(a) for a in const_args)
                      + nb * sum(_nbytes(a) for a in stacked_args)
                      + out_nbytes)
    return pl.CostEstimate(flops=int(flops), transcendentals=int(transcend),
                           bytes_accessed=int(bytes_accessed))


# ---------------- full forward (single pallas_call) ----------------
def siglip_vision_transformer(pixel_values, params, cfg):
    # bf16 patches: halves their DMA and their VMEM residency across the layer loop.
    patches = extract_patches(pixel_values, cfg.patch_size).astype(jnp.bfloat16)
    B, N, CPP = patches.shape
    D, I = cfg.hidden_size, cfg.intermediate_size
    L = cfg.num_hidden_layers
    H = cfg.num_attention_heads
    hd = D // H

    bb = _pick_batch_block(B, N)
    nb = B // bb

    kern = functools.partial(siglip_fused_kernel, num_heads=H, head_dim=hd,
                             eps=cfg.layer_norm_eps)

    def w3(p):    # layer-stacked weight: block (1, *rest), indexed by layer
        return pl.BlockSpec((1,) + p.shape[1:], lambda b, l: (l, 0, 0))

    def wconst(p):  # layer-independent 2-D weight: full block, constant index
        return pl.BlockSpec(p.shape, lambda b, l: (0, 0))

    const_args = (params["patch_w"], params["patch_b"], params["pos_emb"],
                  params["post_g"], params["post_b"])
    stacked_args = (params["ln1_g"], params["ln1_b"], params["wqkv"], params["bqkv"],
                    params["wo"], params["bo"], params["ln2_g"], params["ln2_b"],
                    params["w1"], params["b1"], params["w2"], params["b2"])

    weight_args = (
        params["patch_w"], params["patch_b"], params["pos_emb"],
        params["ln1_g"], params["ln1_b"], params["wqkv"], params["bqkv"],
        params["wo"], params["bo"], params["ln2_g"], params["ln2_b"],
        params["w1"], params["b1"], params["w2"], params["b2"],
        params["post_g"], params["post_b"],
    )

    in_specs = [pl.BlockSpec((bb, N, CPP), lambda b, l: (b, 0, 0)),   # patches
                wconst(params["patch_w"]), wconst(params["patch_b"]),
                wconst(params["pos_emb"]),
                w3(params["ln1_g"]), w3(params["ln1_b"]),
                w3(params["wqkv"]), w3(params["bqkv"]),
                w3(params["wo"]), w3(params["bo"]),
                w3(params["ln2_g"]), w3(params["ln2_b"]),
                w3(params["w1"]), w3(params["b1"]),
                w3(params["w2"]), w3(params["b2"]),
                wconst(params["post_g"]), wconst(params["post_b"])]

    out_nbytes = B * N * D * 4
    cost = _cost_estimate(B, N, CPP, D, I, L, H, nb, patches,
                          const_args, stacked_args, out_nbytes)

    # TODO(synk): for so400m-sized w1/w2 on v7x (64 MiB VMEM), chunk the MLP
    # weights along the intermediate dim (inner grid axis or emit_pipeline).
    return pl.pallas_call(
        kern,
        out_shape=jax.ShapeDtypeStruct((B, N, D), jnp.float32),
        grid=(nb, L),
        in_specs=in_specs,
        out_specs=pl.BlockSpec((bb, N, D), lambda b, l: (b, 0, 0)),
        scratch_shapes=[pltpu.VMEM((bb * N, D), jnp.bfloat16)],   # per-head ctx slab
        compiler_params=pltpu.CompilerParams(
            dimension_semantics=("parallel", "arbitrary"),
            vmem_limit_bytes=_vmem_limit_bytes()),
        cost_estimate=cost,
    )(patches, *weight_args)


# ---------------- parameter init (deterministic, synthetic) ----------------
def init_params(cfg, key):
    D, I = cfg.hidden_size, cfg.intermediate_size
    C, P = cfg.num_channels, cfg.patch_size
    L = cfg.num_hidden_layers
    H = cfg.num_attention_heads
    N = (cfg.image_size // cfg.patch_size) ** 2
    std = 0.02
    wdt = jnp.bfloat16    # matmul weights stored bf16 (half DMA/VMEM, MXU bf16 path)
    q_scale = (D // H) ** -0.5    # folded into Q weights/bias (saves a VPU mul per layer)

    def nrm(k, shape):
        return (std * jax.random.normal(k, shape)).astype(jnp.float32)

    keys = jax.random.split(key, 4)
    # PyTorch conv weight (D, C, P, P) folded into a (C*P*P, D) matmul weight.
    w_conv = nrm(keys[0], (D, C, P, P))
    params = {
        "patch_w": w_conv.reshape(D, C * P * P).T.astype(wdt),
        "patch_b": nrm(keys[1], (1, D)),
        "pos_emb": nrm(keys[2], (N, D)),
        "post_g": jnp.ones((1, D), jnp.float32),
        "post_b": jnp.zeros((1, D), jnp.float32),
    }

    layer_keys = jax.random.split(keys[3], L)
    wqkv, bqkv, wo, bo, w1, b1, w2, b2 = ([] for _ in range(8))
    for li in range(L):
        lk = jax.random.split(layer_keys[li], 12)
        wq, wk, wv = nrm(lk[0], (D, D)), nrm(lk[1], (D, D)), nrm(lk[2], (D, D))
        bq, bk, bv = nrm(lk[3], (1, D)), nrm(lk[4], (1, D)), nrm(lk[5], (1, D))
        # Fold the attention scale into Q (weight AND bias) so the kernel
        # never multiplies by head_dim**-0.5.
        wqkv.append(jnp.concatenate([wq * q_scale, wk, wv], axis=1))
        bqkv.append(jnp.concatenate([bq * q_scale, bk, bv], axis=1))
        wo.append(nrm(lk[6], (D, D)))
        bo.append(nrm(lk[7], (1, D)))
        w1.append(nrm(lk[8], (D, I)))
        b1.append(jnp.zeros((1, I), jnp.float32))
        w2.append(nrm(lk[9], (I, D)))
        b2.append(jnp.zeros((1, D), jnp.float32))

    params.update(
        ln1_g=jnp.ones((L, 1, D), jnp.float32),
        ln1_b=jnp.zeros((L, 1, D), jnp.float32),
        ln2_g=jnp.ones((L, 1, D), jnp.float32),
        ln2_b=jnp.zeros((L, 1, D), jnp.float32),
        wqkv=jnp.stack(wqkv).astype(wdt),
        bqkv=jnp.stack(bqkv),
        wo=jnp.stack(wo).astype(wdt),
        bo=jnp.stack(bo),
        w1=jnp.stack(w1).astype(wdt),
        b1=jnp.stack(b1),
        w2=jnp.stack(w2).astype(wdt),
        b2=jnp.stack(b2),
    )
    return params


if __name__ == "__main__":
    cfg = Config()
    key = jax.random.PRNGKey(0)
    k_params, k_input = jax.random.split(key)
    params = init_params(cfg, k_params)

    B = 2
    pixel_values = jax.random.normal(
        k_input, (B, cfg.num_channels, cfg.image_size, cfg.image_size),
        dtype=jnp.float32)

    forward = jax.jit(lambda pv, p: siglip_vision_transformer(pv, p, cfg))
    out = forward(pixel_values, params)
    out = jax.block_until_ready(out)

    N = (cfg.image_size // cfg.patch_size) ** 2
    assert out.shape == (B, N, cfg.hidden_size)
    assert bool(jnp.all(jnp.isfinite(out)))
    print("KERNEL_OK")
</pallas_src>

<mosaic_0001>
module attributes {stable_mosaic.version = 11 : i64} {
  func.func @siglip_fused_kernel(%arg0: i32, %arg1: i32, %arg2: memref<1x16x192xbf16, #tpu.memory_space<vmem>>, %arg3: memref<192x128xbf16, #tpu.memory_space<vmem>>, %arg4: memref<1x128xf32, #tpu.memory_space<vmem>>, %arg5: memref<16x128xf32, #tpu.memory_space<vmem>>, %arg6: memref<1x1x128xf32, #tpu.memory_space<vmem>>, %arg7: memref<1x1x128xf32, #tpu.memory_space<vmem>>, %arg8: memref<1x128x384xbf16, #tpu.memory_space<vmem>>, %arg9: memref<1x1x384xf32, #tpu.memory_space<vmem>>, %arg10: memref<1x128x128xbf16, #tpu.memory_space<vmem>>, %arg11: memref<1x1x128xf32, #tpu.memory_space<vmem>>, %arg12: memref<1x1x128xf32, #tpu.memory_space<vmem>>, %arg13: memref<1x1x128xf32, #tpu.memory_space<vmem>>, %arg14: memref<1x128x256xbf16, #tpu.memory_space<vmem>>, %arg15: memref<1x1x256xf32, #tpu.memory_space<vmem>>, %arg16: memref<1x256x128xbf16, #tpu.memory_space<vmem>>, %arg17: memref<1x1x128xf32, #tpu.memory_space<vmem>>, %arg18: memref<1x128xf32, #tpu.memory_space<vmem>>, %arg19: memref<1x128xf32, #tpu.memory_space<vmem>>, %arg20: memref<1x16x128xf32, #tpu.memory_space<vmem>>, %arg21: memref<16x128xbf16, #tpu.memory_space<vmem>>) attributes {dimension_semantics = [#tpu.dimension_semantics<parallel>, #tpu.dimension_semantics<arbitrary>], iteration_bounds = array<i64: 2, 2>, scalar_prefetch = 0 : i64, scratch_operands = 1 : i64, tpu.core_type = #tpu.core_type<tc>, window_params = [{transform_indices = @transform_0, window_bounds = array<i64: 1, 16, 192>}, {pipeline_mode = #tpu.pipeline_mode<synchronous>, transform_indices = @transform_1, window_bounds = array<i64: 192, 128>}, {pipeline_mode = #tpu.pipeline_mode<synchronous>, transform_indices = @transform_2, window_bounds = array<i64: 1, 128>}, {pipeline_mode = #tpu.pipeline_mode<synchronous>, transform_indices = @transform_3, window_bounds = array<i64: 16, 128>}, {transform_indices = @transform_4, window_bounds = array<i64: 1, 1, 128>}, {transform_indices = @transform_5, window_bounds = array<i64: 1, 1, 128>}, {transform_indices = @transform_6, window_bounds = array<i64: 1, 128, 384>}, {transform_indices = @transform_7, window_bounds = array<i64: 1, 1, 384>}, {transform_indices = @transform_8, window_bounds = array<i64: 1, 128, 128>}, {transform_indices = @transform_9, window_bounds = array<i64: 1, 1, 128>}, {transform_indices = @transform_10, window_bounds = array<i64: 1, 1, 128>}, {transform_indices = @transform_11, window_bounds = array<i64: 1, 1, 128>}, {transform_indices = @transform_12, window_bounds = array<i64: 1, 128, 256>}, {transform_indices = @transform_13, window_bounds = array<i64: 1, 1, 256>}, {transform_indices = @transform_14, window_bounds = array<i64: 1, 256, 128>}, {transform_indices = @transform_15, window_bounds = array<i64: 1, 1, 128>}, {pipeline_mode = #tpu.pipeline_mode<synchronous>, transform_indices = @transform_16, window_bounds = array<i64: 1, 128>}, {pipeline_mode = #tpu.pipeline_mode<synchronous>, transform_indices = @transform_17, window_bounds = array<i64: 1, 128>}, {transform_indices = @transform_18, window_bounds = array<i64: 1, 16, 128>}]} {
    %c0_i32 = arith.constant 0 : i32
    %0 = arith.cmpi eq, %arg1, %c0_i32 : i32
    %1 = arith.extui %0 : i1 to i32
    %c0_i32_0 = arith.constant 0 : i32
    %2 = arith.cmpi ne, %1, %c0_i32_0 : i32
    scf.if %2 {
      %c0_72 = arith.constant 0 : index
      %c0_73 = arith.constant 0 : index
      %c0_74 = arith.constant 0 : index
      %155 = vector.load %arg2[%c0_72, %c0_73, %c0_74] : memref<1x16x192xbf16, #tpu.memory_space<vmem>>, vector<1x16x192xbf16>
      %156 = vector.shape_cast %155 : vector<1x16x192xbf16> to vector<16x192xbf16>
      %c0_75 = arith.constant 0 : index
      %c0_76 = arith.constant 0 : index
      %157 = vector.load %arg3[%c0_75, %c0_76] : memref<192x128xbf16, #tpu.memory_space<vmem>>, vector<192x128xbf16>
      %cst_77 = arith.constant dense<0.000000e+00> : vector<16x128xf32>
      %158 = tpu.matmul %156, %157, %cst_77 {dimension_numbers = #tpu.dot_dimension_numbers<[1], [0], [0], [1], [0, 0, 1, 1], [], []>} : vector<16x192xbf16>, vector<192x128xbf16>, vector<16x128xf32> -> vector<16x128xf32>
      %159 = vector.shape_cast %158 : vector<16x128xf32> to vector<1x16x128xf32>
      %c0_78 = arith.constant 0 : index
      %c0_79 = arith.constant 0 : index
      %160 = vector.load %arg4[%c0_78, %c0_79] : memref<1x128xf32, #tpu.memory_space<vmem>>, vector<1x128xf32>
      %161 = vector.shape_cast %160 : vector<1x128xf32> to vector<1x1x128xf32>
      %162 = vector.broadcast %161 : vector<1x1x128xf32> to vector<1x16x128xf32>
      %163 = arith.addf %159, %162 : vector<1x16x128xf32>
      %c0_80 = arith.constant 0 : index
      %c0_81 = arith.constant 0 : index
      %164 = vector.load %arg5[%c0_80, %c0_81] : memref<16x128xf32, #tpu.memory_space<vmem>>, vector<16x128xf32>
      %165 = vector.shape_cast %164 : vector<16x128xf32> to vector<1x16x128xf32>
      %166 = arith.addf %163, %165 : vector<1x16x128xf32>
      %c0_82 = arith.constant 0 : index
      %c0_83 = arith.constant 0 : index
      %c0_84 = arith.constant 0 : index
      %167 = vector.load %arg20[%c0_82, %c0_83, %c0_84] : memref<1x16x128xf32, #tpu.memory_space<vmem>>, vector<1x16x128xf32>
      tpu.vector_store %arg20[%c0_82, %c0_83, %c0_84], %166 {strides = array<i32>} : memref<1x16x128xf32, #tpu.memory_space<vmem>>, vector<1x16x128xf32>,
    } else {
    }
    %c0 = arith.constant 0 : index
    %c0_1 = arith.constant 0 : index
    %c0_2 = arith.constant 0 : index
    %3 = vector.load %arg20[%c0, %c0_1, %c0_2] : memref<1x16x128xf32, #tpu.memory_space<vmem>>, vector<1x16x128xf32>
    %4 = vector.shape_cast %3 : vector<1x16x128xf32> to vector<16x128xf32>
    %c0_3 = arith.constant 0 : index
    %c0_4 = arith.constant 0 : index
    %c0_5 = arith.constant 0 : index
    %5 = vector.load %arg6[%c0_3, %c0_4, %c0_5] : memref<1x1x128xf32, #tpu.memory_space<vmem>>, vector<1x1x128xf32>
    %6 = vector.shape_cast %5 : vector<1x1x128xf32> to vector<1x128xf32>
    %c0_6 = arith.constant 0 : index
    %c0_7 = arith.constant 0 : index
    %c0_8 = arith.constant 0 : index
    %7 = vector.load %arg7[%c0_6, %c0_7, %c0_8] : memref<1x1x128xf32, #tpu.memory_space<vmem>>, vector<1x1x128xf32>
    %8 = vector.shape_cast %7 : vector<1x1x128xf32> to vector<1x128xf32>
    %cst = arith.constant dense<0.000000e+00> : vector<16xf32>
    %9 = vector.multi_reduction <add>, %4, %cst [1] : vector<16x128xf32> to vector<16xf32>
    %10 = vector.shape_cast %9 : vector<16xf32> to vector<16x1xf32>
    %cst_9 = arith.constant 1.280000e+02 : f32
    %11 = vector.broadcast %cst_9 : f32 to vector<16x1xf32>
    %12 = arith.divf %10, %11 : vector<16x1xf32>
    %13 = vector.broadcast %12 : vector<16x1xf32> to vector<16x128xf32>
    %14 = arith.subf %4, %13 : vector<16x128xf32>
    %15 = arith.mulf %14, %14 : vector<16x128xf32>
    %cst_10 = arith.constant dense<0.000000e+00> : vector<16xf32>
    %16 = vector.multi_reduction <add>, %15, %cst_10 [1] : vector<16x128xf32> to vector<16xf32>
    %17 = vector.shape_cast %16 : vector<16xf32> to vector<16x1xf32>
    %cst_11 = arith.constant 1.280000e+02 : f32
    %18 = vector.broadcast %cst_11 : f32 to vector<16x1xf32>
    %19 = arith.divf %17, %18 : vector<16x1xf32>
    %20 = vector.broadcast %12 : vector<16x1xf32> to vector<16x128xf32>
    %21 = arith.subf %4, %20 : vector<16x128xf32>
    %cst_12 = arith.constant 9.99999997E-7 : f32
    %22 = vector.broadcast %cst_12 : f32 to vector<16x1xf32>
    %23 = arith.addf %19, %22 : vector<16x1xf32>
    %24 = math.rsqrt %23 : vector<16x1xf32>
    %25 = vector.broadcast %24 : vector<16x1xf32> to vector<16x128xf32>
    %26 = arith.mulf %21, %25 : vector<16x128xf32>
    %27 = vector.broadcast %6 : vector<1x128xf32> to vector<16x128xf32>
    %28 = arith.mulf %26, %27 : vector<16x128xf32>
    %29 = vector.broadcast %8 : vector<1x128xf32> to vector<16x128xf32>
    %30 = arith.addf %28, %29 : vector<16x128xf32>
    %31 = arith.truncf %30 : vector<16x128xf32> to vector<16x128xbf16>
    %c0_13 = arith.constant 0 : index
    %c0_14 = arith.constant 0 : index
    %c0_15 = arith.constant 0 : index
    %32 = vector.load %arg8[%c0_13, %c0_14, %c0_15] : memref<1x128x384xbf16, #tpu.memory_space<vmem>>, vector<1x128x384xbf16>
    %33 = vector.shape_cast %32 : vector<1x128x384xbf16> to vector<128x384xbf16>
    %cst_16 = arith.constant dense<0.000000e+00> : vector<16x384xf32>
    %34 = tpu.matmul %31, %33, %cst_16 {dimension_numbers = #tpu.dot_dimension_numbers<[1], [0], [0], [1], [0, 0, 1, 1], [], []>} : vector<16x128xbf16>, vector<128x384xbf16>, vector<16x384xf32> -> vector<16x384xf32>
    %c0_17 = arith.constant 0 : index
    %c0_18 = arith.constant 0 : index
    %c0_19 = arith.constant 0 : index
    %35 = vector.load %arg9[%c0_17, %c0_18, %c0_19] : memref<1x1x384xf32, #tpu.memory_space<vmem>>, vector<1x1x384xf32>
    %36 = vector.shape_cast %35 : vector<1x1x384xf32> to vector<1x384xf32>
    %37 = vector.broadcast %36 : vector<1x384xf32> to vector<16x384xf32>
    %38 = arith.addf %34, %37 : vector<16x384xf32>
    %39 = arith.truncf %38 : vector<16x384xf32> to vector<16x384xbf16>
    %40 = vector.extract_strided_slice %39 {offsets = [0, 0], sizes = [16, 64], strides = [1, 1]} : vector<16x384xbf16> to vector<16x64xbf16>
    %41 = vector.shape_cast %40 : vector<16x64xbf16> to vector<1x16x64xbf16>
    %42 = vector.extract_strided_slice %39 {offsets = [0, 128], sizes = [16, 64], strides = [1, 1]} : vector<16x384xbf16> to vector<16x64xbf16>
    %43 = vector.shape_cast %42 : vector<16x64xbf16> to vector<1x16x64xbf16>
    %44 = vector.extract_strided_slice %39 {offsets = [0, 256], sizes = [16, 64], strides = [1, 1]} : vector<16x384xbf16> to vector<16x64xbf16>
    %45 = vector.shape_cast %44 : vector<16x64xbf16> to vector<1x16x64xbf16>
    "tpu.trace_start"() <{level = 10 : i32, message = "bqd,bkd->bqk"}> : () -> ()
    %cst_20 = arith.constant dense<0.000000e+00> : vector<1x16x16xf32>
    %46 = tpu.matmul %41, %43, %cst_20 {dimension_numbers = #tpu.dot_dimension_numbers<[2], [2], [1], [1], [0, 0, 0, 1, 1, 1], [0], [0]>} : vector<1x16x64xbf16>, vector<1x16x64xbf16>, vector<1x16x16xf32> -> vector<1x16x16xf32>
    "tpu.trace_stop"() : () -> ()
    %cst_21 = arith.constant dense<0xFF800000> : vector<1x16xf32>
    %47 = vector.multi_reduction <maximumf>, %46, %cst_21 [2] : vector<1x16x16xf32> to vector<1x16xf32>
    %48 = vector.shape_cast %47 : vector<1x16xf32> to vector<1x16x1xf32>
    %49 = vector.broadcast %48 : vector<1x16x1xf32> to vector<1x16x16xf32>
    %50 = arith.subf %46, %49 : vector<1x16x16xf32>
    %51 = math.exp %50 : vector<1x16x16xf32>
    %cst_22 = arith.constant dense<0.000000e+00> : vector<1x16xf32>
    %52 = vector.multi_reduction <add>, %51, %cst_22 [2] : vector<1x16x16xf32> to vector<1x16xf32>
    %53 = vector.shape_cast %52 : vector<1x16xf32> to vector<1x16x1xf32>
    %54 = tpu.reciprocal %53 {approx = true} : vector<1x16x1xf32> -> vector<1x16x1xf32>
    %55 = vector.broadcast %54 : vector<1x16x1xf32> to vector<1x16x16xf32>
    %56 = arith.mulf %51, %55 : vector<1x16x16xf32>
    %57 = arith.truncf %56 : vector<1x16x16xf32> to vector<1x16x16xbf16>
    "tpu.trace_start"() <{level = 10 : i32, message = "bqk,bkd->bqd"}> : () -> ()
    %cst_23 = arith.constant dense<0.000000e+00> : vector<1x16x64xf32>
    %58 = tpu.matmul %57, %45, %cst_23 {dimension_numbers = #tpu.dot_dimension_numbers<[2], [1], [1], [2], [0, 0, 0, 1, 1, 2], [0], [0]>} : vector<1x16x16xbf16>, vector<1x16x64xbf16>, vector<1x16x64xf32> -> vector<1x16x64xf32>
    "tpu.trace_stop"() : () -> ()
    %59 = vector.shape_cast %58 : vector<1x16x64xf32> to vector<16x64xf32>
    %60 = arith.truncf %59 : vector<16x64xf32> to vector<16x64xbf16>
    %c0_24 = arith.constant 0 : index
    %c0_25 = arith.constant 0 : index
    %61 = vector.load %arg21[%c0_24, %c0_25] : memref<16x128xbf16, #tpu.memory_space<vmem>>, vector<16x64xbf16>
    tpu.vector_store %arg21[%c0_24, %c0_25], %60 {strides = array<i32>} : memref<16x128xbf16, #tpu.memory_space<vmem>>, vector<16x64xbf16>,
    %62 = vector.extract_strided_slice %39 {offsets = [0, 64], sizes = [16, 64], strides = [1, 1]} : vector<16x384xbf16> to vector<16x64xbf16>
    %63 = vector.shape_cast %62 : vector<16x64xbf16> to vector<1x16x64xbf16>
    %64 = vector.extract_strided_slice %39 {offsets = [0, 192], sizes = [16, 64], strides = [1, 1]} : vector<16x384xbf16> to vector<16x64xbf16>
    %65 = vector.shape_cast %64 : vector<16x64xbf16> to vector<1x16x64xbf16>
    %66 = vector.extract_strided_slice %39 {offsets = [0, 320], sizes = [16, 64], strides = [1, 1]} : vector<16x384xbf16> to vector<16x64xbf16>
    %67 = vector.shape_cast %66 : vector<16x64xbf16> to vector<1x16x64xbf16>
    "tpu.trace_start"() <{level = 10 : i32, message = "bqd,bkd->bqk"}> : () -> ()
    %cst_26 = arith.constant dense<0.000000e+00> : vector<1x16x16xf32>
    %68 = tpu.matmul %63, %65, %cst_26 {dimension_numbers = #tpu.dot_dimension_numbers<[2], [2], [1], [1], [0, 0, 0, 1, 1, 1], [0], [0]>} : vector<1x16x64xbf16>, vector<1x16x64xbf16>, vector<1x16x16xf32> -> vector<1x16x16xf32>
    "tpu.trace_stop"() : () -> ()
    %cst_27 = arith.constant dense<0xFF800000> : vector<1x16xf32>
    %69 = vector.multi_reduction <maximumf>, %68, %cst_27 [2] : vector<1x16x16xf32> to vector<1x16xf32>
    %70 = vector.shape_cast %69 : vector<1x16xf32> to vector<1x16x1xf32>
    %71 = vector.broadcast %70 : vector<1x16x1xf32> to vector<1x16x16xf32>
    %72 = arith.subf %68, %71 : vector<1x16x16xf32>
    %73 = math.exp %72 : vector<1x16x16xf32>
    %cst_28 = arith.constant dense<0.000000e+00> : vector<1x16xf32>
    %74 = vector.multi_reduction <add>, %73, %cst_28 [2] : vector<1x16x16xf32> to vector<1x16xf32>
    %75 = vector.shape_cast %74 : vector<1x16xf32> to vector<1x16x1xf32>
    %76 = tpu.reciprocal %75 {approx = true} : vector<1x16x1xf32> -> vector<1x16x1xf32>
    %77 = vector.broadcast %76 : vector<1x16x1xf32> to vector<1x16x16xf32>
    %78 = arith.mulf %73, %77 : vector<1x16x16xf32>
    %79 = arith.truncf %78 : vector<1x16x16xf32> to vector<1x16x16xbf16>
    "tpu.trace_start"() <{level = 10 : i32, message = "bqk,bkd->bqd"}> : () -> ()
    %cst_29 = arith.constant dense<0.000000e+00> : vector<1x16x64xf32>
    %80 = tpu.matmul %79, %67, %cst_29 {dimension_numbers = #tpu.dot_dimension_numbers<[2], [1], [1], [2], [0, 0, 0, 1, 1, 2], [0], [0]>} : vector<1x16x16xbf16>, vector<1x16x64xbf16>, vector<1x16x64xf32> -> vector<1x16x64xf32>
    "tpu.trace_stop"() : () -> ()
    %81 = vector.shape_cast %80 : vector<1x16x64xf32> to vector<16x64xf32>
    %82 = arith.truncf %81 : vector<16x64xf32> to vector<16x64xbf16>
    %c0_30 = arith.constant 0 : index
    %c64 = arith.constant 64 : index
    %83 = vector.load %arg21[%c0_30, %c64] : memref<16x128xbf16, #tpu.memory_space<vmem>>, vector<16x64xbf16>
    tpu.vector_store %arg21[%c0_30, %c64], %82 {strides = array<i32>} : memref<16x128xbf16, #tpu.memory_space<vmem>>, vector<16x64xbf16>,
    %c0_31 = arith.constant 0 : index
    %c0_32 = arith.constant 0 : index
    %84 = vector.load %arg21[%c0_31, %c0_32] : memref<16x128xbf16, #tpu.memory_space<vmem>>, vector<16x128xbf16>
    %c0_33 = arith.constant 0 : index
    %c0_34 = arith.constant 0 : index
    %c0_35 = arith.constant 0 : index
    %85 = vector.load %arg10[%c0_33, %c0_34, %c0_35] : memref<1x128x128xbf16, #tpu.memory_space<vmem>>, vector<1x128x128xbf16>
    %86 = vector.shape_cast %85 : vector<1x128x128xbf16> to vector<128x128xbf16>
    %cst_36 = arith.constant dense<0.000000e+00> : vector<16x128xf32>
    %87 = tpu.matmul %84, %86, %cst_36 {dimension_numbers = #tpu.dot_dimension_numbers<[1], [0], [0], [1], [0, 0, 1, 1], [], []>} : vector<16x128xbf16>, vector<128x128xbf16>, vector<16x128xf32> -> vector<16x128xf32>
    %c0_37 = arith.constant 0 : index
    %c0_38 = arith.constant 0 : index
    %c0_39 = arith.constant 0 : index
    %88 = vector.load %arg11[%c0_37, %c0_38, %c0_39] : memref<1x1x128xf32, #tpu.memory_space<vmem>>, vector<1x1x128xf32>
    %89 = vector.shape_cast %88 : vector<1x1x128xf32> to vector<1x128xf32>
    %90 = vector.broadcast %89 : vector<1x128xf32> to vector<16x128xf32>
    %91 = arith.addf %87, %90 : vector<16x128xf32>
    %92 = arith.addf %4, %91 : vector<16x128xf32>
    %c0_40 = arith.constant 0 : index
    %c0_41 = arith.constant 0 : index
    %c0_42 = arith.constant 0 : index
    %93 = vector.load %arg12[%c0_40, %c0_41, %c0_42] : memref<1x1x128xf32, #tpu.memory_space<vmem>>, vector<1x1x128xf32>
    %94 = vector.shape_cast %93 : vector<1x1x128xf32> to vector<1x128xf32>
    %c0_43 = arith.constant 0 : index
    %c0_44 = arith.constant 0 : index
    %c0_45 = arith.constant 0 : index
    %95 = vector.load %arg13[%c0_43, %c0_44, %c0_45] : memref<1x1x128xf32, #tpu.memory_space<vmem>>, vector<1x1x128xf32>
    %96 = vector.shape_cast %95 : vector<1x1x128xf32> to vector<1x128xf32>
    %cst_46 = arith.constant dense<0.000000e+00> : vector<16xf32>
    %97 = vector.multi_reduction <add>, %92, %cst_46 [1] : vector<16x128xf32> to vector<16xf32>
    %98 = vector.shape_cast %97 : vector<16xf32> to vector<16x1xf32>
    %cst_47 = arith.constant 1.280000e+02 : f32
    %99 = vector.broadcast %cst_47 : f32 to vector<16x1xf32>
    %100 = arith.divf %98, %99 : vector<16x1xf32>
    %101 = vector.broadcast %100 : vector<16x1xf32> to vector<16x128xf32>
    %102 = arith.subf %92, %101 : vector<16x128xf32>
    %103 = arith.mulf %102, %102 : vector<16x128xf32>
    %cst_48 = arith.constant dense<0.000000e+00> : vector<16xf32>
    %104 = vector.multi_reduction <add>, %103, %cst_48 [1] : vector<16x128xf32> to vector<16xf32>
    %105 = vector.shape_cast %104 : vector<16xf32> to vector<16x1xf32>
    %cst_49 = arith.constant 1.280000e+02 : f32
    %106 = vector.broadcast %cst_49 : f32 to vector<16x1xf32>
    %107 = arith.divf %105, %106 : vector<16x1xf32>
    %108 = vector.broadcast %100 : vector<16x1xf32> to vector<16x128xf32>
    %109 = arith.subf %92, %108 : vector<16x128xf32>
    %cst_50 = arith.constant 9.99999997E-7 : f32
    %110 = vector.broadcast %cst_50 : f32 to vector<16x1xf32>
    %111 = arith.addf %107, %110 : vector<16x1xf32>
    %112 = math.rsqrt %111 : vector<16x1xf32>
    %113 = vector.broadcast %112 : vector<16x1xf32> to vector<16x128xf32>
    %114 = arith.mulf %109, %113 : vector<16x128xf32>
    %115 = vector.broadcast %94 : vector<1x128xf32> to vector<16x128xf32>
    %116 = arith.mulf %114, %115 : vector<16x128xf32>
    %117 = vector.broadcast %96 : vector<1x128xf32> to vector<16x128xf32>
    %118 = arith.addf %116, %117 : vector<16x128xf32>
    %119 = arith.truncf %118 : vector<16x128xf32> to vector<16x128xbf16>
    %c0_51 = arith.constant 0 : index
    %c0_52 = arith.constant 0 : index
    %c0_53 = arith.constant 0 : index
    %120 = vector.load %arg14[%c0_51, %c0_52, %c0_53] : memref<1x128x256xbf16, #tpu.memory_space<vmem>>, vector<1x128x256xbf16>
    %121 = vector.shape_cast %120 : vector<1x128x256xbf16> to vector<128x256xbf16>
    %cst_54 = arith.constant dense<0.000000e+00> : vector<16x256xf32>
    %122 = tpu.matmul %119, %121, %cst_54 {dimension_numbers = #tpu.dot_dimension_numbers<[1], [0], [0], [1], [0, 0, 1, 1], [], []>} : vector<16x128xbf16>, vector<128x256xbf16>, vector<16x256xf32> -> vector<16x256xf32>
    %c0_55 = arith.constant 0 : index
    %c0_56 = arith.constant 0 : index
    %c0_57 = arith.constant 0 : index
    %123 = vector.load %arg15[%c0_55, %c0_56, %c0_57] : memref<1x1x256xf32, #tpu.memory_space<vmem>>, vector<1x1x256xf32>
    %124 = vector.shape_cast %123 : vector<1x1x256xf32> to vector<1x256xf32>
    %125 = vector.broadcast %124 : vector<1x256xf32> to vector<16x256xf32>
    %126 = arith.addf %122, %125 : vector<16x256xf32>
    %cst_58 = arith.constant 5.000000e-01 : f32
    %127 = vector.broadcast %cst_58 : f32 to vector<16x256xf32>
    %128 = arith.mulf %127, %126 : vector<16x256xf32>
    %cst_59 = arith.constant 4.471500e-02 : f32
    %129 = vector.broadcast %cst_59 : f32 to vector<16x256xf32>
    %130 = arith.mulf %129, %126 : vector<16x256xf32>
    %131 = arith.mulf %130, %126 : vector<16x256xf32>
    %132 = arith.mulf %131, %126 : vector<16x256xf32>
    %133 = arith.addf %126, %132 : vector<16x256xf32>
    %cst_60 = arith.constant 0.797884583 : f32
    %134 = vector.broadcast %cst_60 : f32 to vector<16x256xf32>
    %135 = arith.mulf %134, %133 : vector<16x256xf32>
    %136 = math.tanh %135 : vector<16x256xf32>
    %cst_61 = arith.constant 1.000000e+00 : f32
    %137 = vector.broadcast %cst_61 : f32 to vector<16x256xf32>
    %138 = arith.addf %137, %136 : vector<16x256xf32>
    %139 = arith.mulf %128, %138 : vector<16x256xf32>
    %140 = arith.truncf %139 : vector<16x256xf32> to vector<16x256xbf16>
    %c0_62 = arith.constant 0 : index
    %c0_63 = arith.constant 0 : index
    %c0_64 = arith.constant 0 : index
    %141 = vector.load %arg16[%c0_62, %c0_63, %c0_64] : memref<1x256x128xbf16, #tpu.memory_space<vmem>>, vector<1x256x128xbf16>
    %142 = vector.shape_cast %141 : vector<1x256x128xbf16> to vector<256x128xbf16>
    %cst_65 = arith.constant dense<0.000000e+00> : vector<16x128xf32>
    %143 = tpu.matmul %140, %142, %cst_65 {dimension_numbers = #tpu.dot_dimension_numbers<[1], [0], [0], [1], [0, 0, 1, 1], [], []>} : vector<16x256xbf16>, vector<256x128xbf16>, vector<16x128xf32> -> vector<16x128xf32>
    %c0_66 = arith.constant 0 : index
    %c0_67 = arith.constant 0 : index
    %c0_68 = arith.constant 0 : index
    %144 = vector.load %arg17[%c0_66, %c0_67, %c0_68] : memref<1x1x128xf32, #tpu.memory_space<vmem>>, vector<1x1x128xf32>
    %145 = vector.shape_cast %144 : vector<1x1x128xf32> to vector<1x128xf32>
    %146 = vector.broadcast %145 : vector<1x128xf32> to vector<16x128xf32>
    %147 = arith.addf %143, %146 : vector<16x128xf32>
    %148 = arith.addf %92, %147 : vector<16x128xf32>
    %c1_i32 = arith.constant 1 : i32
    %149 = arith.cmpi slt, %arg1, %c1_i32 : i32
    %150 = arith.extui %149 : i1 to i32
    %c0_i32_69 = arith.constant 0 : i32
    %151 = arith.cmpi ne, %150, %c0_i32_69 : i32
    scf.if %151 {
      %155 = vector.shape_cast %148 : vector<16x128xf32> to vector<1x16x128xf32>
      %c0_72 = arith.constant 0 : index
      %c0_73 = arith.constant 0 : index
      %c0_74 = arith.constant 0 : index
      %156 = vector.load %arg20[%c0_72, %c0_73, %c0_74] : memref<1x16x128xf32, #tpu.memory_space<vmem>>, vector<1x16x128xf32>
      tpu.vector_store %arg20[%c0_72, %c0_73, %c0_74], %155 {strides = array<i32>} : memref<1x16x128xf32, #tpu.memory_space<vmem>>, vector<1x16x128xf32>,
    } else {
    }
    %c1_i32_70 = arith.constant 1 : i32
    %152 = arith.cmpi eq, %arg1, %c1_i32_70 : i32
    %153 = arith.extui %152 : i1 to i32
    %c0_i32_71 = arith.constant 0 : i32
    %154 = arith.cmpi ne, %153, %c0_i32_71 : i32
    scf.if %154 {
      %c0_72 = arith.constant 0 : index
      %c0_73 = arith.constant 0 : index
      %155 = vector.load %arg18[%c0_72, %c0_73] : memref<1x128xf32, #tpu.memory_space<vmem>>, vector<1x128xf32>
      %c0_74 = arith.constant 0 : index
      %c0_75 = arith.constant 0 : index
      %156 = vector.load %arg19[%c0_74, %c0_75] : memref<1x128xf32, #tpu.memory_space<vmem>>, vector<1x128xf32>
      %cst_76 = arith.constant dense<0.000000e+00> : vector<16xf32>
      %157 = vector.multi_reduction <add>, %148, %cst_76 [1] : vector<16x128xf32> to vector<16xf32>
      %158 = vector.shape_cast %157 : vector<16xf32> to vector<16x1xf32>
      %cst_77 = arith.constant 1.280000e+02 : f32
      %159 = vector.broadcast %cst_77 : f32 to vector<16x1xf32>
      %160 = arith.divf %158, %159 : vector<16x1xf32>
      %161 = vector.broadcast %160 : vector<16x1xf32> to vector<16x128xf32>
      %162 = arith.subf %148, %161 : vector<16x128xf32>
      %163 = arith.mulf %162, %162 : vector<16x128xf32>
      %cst_78 = arith.constant dense<0.000000e+00> : vector<16xf32>
      %164 = vector.multi_reduction <add>, %163, %cst_78 [1] : vector<16x128xf32> to vector<16xf32>
      %165 = vector.shape_cast %164 : vector<16xf32> to vector<16x1xf32>
      %cst_79 = arith.constant 1.280000e+02 : f32
      %166 = vector.broadcast %cst_79 : f32 to vector<16x1xf32>
      %167 = arith.divf %165, %166 : vector<16x1xf32>
      %168 = vector.broadcast %160 : vector<16x1xf32> to vector<16x128xf32>
      %169 = arith.subf %148, %168 : vector<16x128xf32>
      %cst_80 = arith.constant 9.99999997E-7 : f32
      %170 = vector.broadcast %cst_80 : f32 to vector<16x1xf32>
      %171 = arith.addf %167, %170 : vector<16x1xf32>
      %172 = math.rsqrt %171 : vector<16x1xf32>
      %173 = vector.broadcast %172 : vector<16x1xf32> to vector<16x128xf32>
      %174 = arith.mulf %169, %173 : vector<16x128xf32>
      %175 = vector.broadcast %155 : vector<1x128xf32> to vector<16x128xf32>
      %176 = arith.mulf %174, %175 : vector<16x128xf32>
      %177 = vector.broadcast %156 : vector<1x128xf32> to vector<16x128xf32>
      %178 = arith.addf %176, %177 : vector<16x128xf32>
      %179 = vector.shape_cast %178 : vector<16x128xf32> to vector<1x16x128xf32>
      %c0_81 = arith.constant 0 : index
      %c0_82 = arith.constant 0 : index
      %c0_83 = arith.constant 0 : index
      %180 = vector.load %arg20[%c0_81, %c0_82, %c0_83] : memref<1x16x128xf32, #tpu.memory_space<vmem>>, vector<1x16x128xf32>
      tpu.vector_store %arg20[%c0_81, %c0_82, %c0_83], %179 {strides = array<i32>} : memref<1x16x128xf32, #tpu.memory_space<vmem>>, vector<1x16x128xf32>,
    } else {
    }
    return
  }
  func.func @transform_0(%arg0: i32, %arg1: i32) -> (i32, i32, i32) {
    %c0_i32 = arith.constant 0 : i32
    %c0_i32_0 = arith.constant 0 : i32
    %c0_i32_1 = arith.constant 0 : i32
    return %arg0, %c0_i32, %c0_i32_0 : i32, i32, i32
  }
  func.func @transform_1(%arg0: i32, %arg1: i32) -> (i32, i32) {
    %c0_i32 = arith.constant 0 : i32
    %c0_i32_0 = arith.constant 0 : i32
    %c0_i32_1 = arith.constant 0 : i32
    return %c0_i32, %c0_i32_0 : i32, i32
  }
  func.func @transform_2(%arg0: i32, %arg1: i32) -> (i32, i32) {
    %c0_i32 = arith.constant 0 : i32
    %c0_i32_0 = arith.constant 0 : i32
    %c0_i32_1 = arith.constant 0 : i32
    return %c0_i32, %c0_i32_0 : i32, i32
  }
  func.func @transform_3(%arg0: i32, %arg1: i32) -> (i32, i32) {
    %c0_i32 = arith.constant 0 : i32
    %c0_i32_0 = arith.constant 0 : i32
    %c0_i32_1 = arith.constant 0 : i32
    return %c0_i32, %c0_i32_0 : i32, i32
  }
  func.func @transform_4(%arg0: i32, %arg1: i32) -> (i32, i32, i32) {
    %c0_i32 = arith.constant 0 : i32
    %c0_i32_0 = arith.constant 0 : i32
    %c0_i32_1 = arith.constant 0 : i32
    return %arg1, %c0_i32, %c0_i32_0 : i32, i32, i32
  }
  func.func @transform_5(%arg0: i32, %arg1: i32) -> (i32, i32, i32) {
    %c0_i32 = arith.constant 0 : i32
    %c0_i32_0 = arith.constant 0 : i32
    %c0_i32_1 = arith.constant 0 : i32
    return %arg1, %c0_i32, %c0_i32_0 : i32, i32, i32
  }
  func.func @transform_6(%arg0: i32, %arg1: i32) -> (i32, i32, i32) {
    %c0_i32 = arith.constant 0 : i32
    %c0_i32_0 = arith.constant 0 : i32
    %c0_i32_1 = arith.constant 0 : i32
    return %arg1, %c0_i32, %c0_i32_0 : i32, i32, i32
  }
  func.func @transform_7(%arg0: i32, %arg1: i32) -> (i32, i32, i32) {
    %c0_i32 = arith.constant 0 : i32
    %c0_i32_0 = arith.constant 0 : i32
    %c0_i32_1 = arith.constant 0 : i32
    return %arg1, %c0_i32, %c0_i32_0 : i32, i32, i32
  }
  func.func @transform_8(%arg0: i32, %arg1: i32) -> (i32, i32, i32) {
    %c0_i32 = arith.constant 0 : i32
    %c0_i32_0 = arith.constant 0 : i32
    %c0_i32_1 = arith.constant 0 : i32
    return %arg1, %c0_i32, %c0_i32_0 : i32, i32, i32
  }
  func.func @transform_9(%arg0: i32, %arg1: i32) -> (i32, i32, i32) {
    %c0_i32 = arith.constant 0 : i32
    %c0_i32_0 = arith.constant 0 : i32
    %c0_i32_1 = arith.constant 0 : i32
    return %arg1, %c0_i32, %c0_i32_0 : i32, i32, i32
  }
  func.func @transform_10(%arg0: i32, %arg1: i32) -> (i32, i32, i32) {
    %c0_i32 = arith.constant 0 : i32
    %c0_i32_0 = arith.constant 0 : i32
    %c0_i32_1 = arith.constant 0 : i32
    return %arg1, %c0_i32, %c0_i32_0 : i32, i32, i32
  }
  func.func @transform_11(%arg0: i32, %arg1: i32) -> (i32, i32, i32) {
    %c0_i32 = arith.constant 0 : i32
    %c0_i32_0 = arith.constant 0 : i32
    %c0_i32_1 = arith.constant 0 : i32
    return %arg1, %c0_i32, %c0_i32_0 : i32, i32, i32
  }
  func.func @transform_12(%arg0: i32, %arg1: i32) -> (i32, i32, i32) {
    %c0_i32 = arith.constant 0 : i32
    %c0_i32_0 = arith.constant 0 : i32
    %c0_i32_1 = arith.constant 0 : i32
    return %arg1, %c0_i32, %c0_i32_0 : i32, i32, i32
  }
  func.func @transform_13(%arg0: i32, %arg1: i32) -> (i32, i32, i32) {
    %c0_i32 = arith.constant 0 : i32
    %c0_i32_0 = arith.constant 0 : i32
    %c0_i32_1 = arith.constant 0 : i32
    return %arg1, %c0_i32, %c0_i32_0 : i32, i32, i32
  }
  func.func @transform_14(%arg0: i32, %arg1: i32) -> (i32, i32, i32) {
    %c0_i32 = arith.constant 0 : i32
    %c0_i32_0 = arith.constant 0 : i32
    %c0_i32_1 = arith.constant 0 : i32
    return %arg1, %c0_i32, %c0_i32_0 : i32, i32, i32
  }
  func.func @transform_15(%arg0: i32, %arg1: i32) -> (i32, i32, i32) {
    %c0_i32 = arith.constant 0 : i32
    %c0_i32_0 = arith.constant 0 : i32
    %c0_i32_1 = arith.constant 0 : i32
    return %arg1, %c0_i32, %c0_i32_0 : i32, i32, i32
  }
  func.func @transform_16(%arg0: i32, %arg1: i32) -> (i32, i32) {
    %c0_i32 = arith.constant 0 : i32
    %c0_i32_0 = arith.constant 0 : i32
    %c0_i32_1 = arith.constant 0 : i32
    return %c0_i32, %c0_i32_0 : i32, i32
  }
  func.func @transform_17(%arg0: i32, %arg1: i32) -> (i32, i32) {
    %c0_i32 = arith.constant 0 : i32
    %c0_i32_0 = arith.constant 0 : i32
    %c0_i32_1 = arith.constant 0 : i32
    return %c0_i32, %c0_i32_0 : i32, i32
  }
  func.func @transform_18(%arg0: i32, %arg1: i32) -> (i32, i32, i32) {
    %c0_i32 = arith.constant 0 : i32
    %c0_i32_0 = arith.constant 0 : i32
    %c0_i32_1 = arith.constant 0 : i32
    return %arg0, %c0_i32, %c0_i32_0 : i32, i32, i32
  }
}

</mosaic_0001>

<bundles_post_ra>
// kernel: _lambda_.1
= control target key start
LH: loop header
LB: loop body
LE: loop exit
PB: predicated region body
PF: predicated region fallthrough
CT: control target
= control target key end

     0   :  { %s5165_s0 = inlined_call_operand.hbm [shape: bf16[2,16,192], index: 0, kind: input, shape index: {}]   ;;  %s5166_s1 = inlined_call_operand.hbm [shape: bf16[192,128], index: 1, kind: input, shape index: {}]   ;;  %s5167_s2 = inlined_call_operand.hbm [shape: f32[1,128], index: 2, kind: input, shape index: {}]   ;;  %s5168_s3 = inlined_call_operand.hbm [shape: f32[16,128], index: 3, kind: input, shape index: {}]   ;;  %s5169_s4 = inlined_call_operand.hbm [shape: f32[2,1,128], index: 4, kind: input, shape index: {}]   ;;  %s5170_s5 = inlined_call_operand.hbm [shape: f32[2,1,128], index: 5, kind: input, shape index: {}]   ;;  %s5171_s6 = inlined_call_operand.hbm [shape: bf16[2,128,384], index: 6, kind: input, shape index: {}]   ;;  %s5172_s7 = inlined_call_operand.hbm [shape: f32[2,1,384], index: 7, kind: input, shape index: {}]   ;;  %s5173_s8 = inlined_call_operand.hbm [shape: bf16[2,128,128], index: 8, kind: input, shape index: {}]   ;;  %s5174_s9 = inlined_call_operand.hbm [shape: f32[2,1,128], index: 9, kind: input, shape index: {}]   ;;  %s5175_s10 = inlined_call_operand.hbm [shape: f32[2,1,128], index: 10, kind: input, shape index: {}]   ;;  %s5176_s11 = inlined_call_operand.hbm [shape: f32[2,1,128], index: 11, kind: input, shape index: {}]   ;;  %s5177_s12 = inlined_call_operand.hbm [shape: bf16[2,128,256], index: 12, kind: input, shape index: {}]   ;;  %s5178_s13 = inlined_call_operand.hbm [shape: f32[2,1,256], index: 13, kind: input, shape index: {}]   ;;  %s5179_s14 = inlined_call_operand.hbm [shape: bf16[2,256,128], index: 14, kind: input, shape index: {}]   ;;  %s5180_s15 = inlined_call_operand.hbm [shape: f32[2,1,128], index: 15, kind: input, shape index: {}]   ;;  %s5181_s16 = inlined_call_operand.hbm [shape: f32[1,128], index: 16, kind: input, shape index: {}]   ;;  %s5182_s17 = inlined_call_operand.hbm [shape: f32[1,128], index: 17, kind: input, shape index: {}]   ;;  %s5183_s18 = inlined_call_operand.hbm [shape: f32[2,16,128], index: 18, kind: output, shape index: {}]  }
   0x1   :  { %5234 = sst [smem:[#allocation48_spill]] %s5165_s0 }
   0x2   :  { %5235 = sst [smem:[#allocation49_spill]] %s5166_s1 }
   0x3   :  { %5236 = sst [smem:[#allocation50_spill]] %s5167_s2 }
   0x4   :  { %5237 = sst [smem:[#allocation51_spill]] %s5168_s3 }
   0x5   :  { %5238 = sst [smem:[#allocation52_spill]] %s5169_s4 }
   0x6   :  { %5239 = sst [smem:[#allocation53_spill]] %s5170_s5 }
   0x7   :  { %5240 = sst [smem:[#allocation54_spill]] %s5171_s6 }
   0x8   :  { %5241 = sst [smem:[#allocation55_spill]] %s5172_s7 }
   0x9   :  { %5242 = sst [smem:[#allocation56_spill]] %s5173_s8 }
   0xa   :  { %5243 = sst [smem:[#allocation57_spill]] %s5174_s9 }
   0xb   :  { %5244 = sst [smem:[#allocation58_spill]] %s5175_s10 }
   0xc   :  { %5245 = sst [smem:[#allocation59_spill]] %s5176_s11 }
   0xd   :  { %5246 = sst [smem:[#allocation60_spill]] %s5177_s12 }
   0xe   :  { %5247 = sst [smem:[#allocation61_spill]] %s5178_s13 }
   0xf   :  { %5248 = sst [smem:[#allocation62_spill]] %s5179_s14 }
  0x10   :  { %5249 = sst [smem:[#allocation63_spill]] %s5180_s15 }
  0x11   :  { %5250 = sst [smem:[#allocation64_spill]] %s5181_s16 }
  0x12   :  { %5251 = sst [smem:[#allocation65_spill]] %s5182_s17 }
  0x13   :  { %5252 = sst [smem:[#allocation66_spill]] %s5183_s18 }
  0x14   :  { %23 = vsyncpa [#allocation4], 0 }
  0x15   :  { %25 = vsyncpa [#allocation4 + $0x1], 0 }
  0x16   :  { %26 = vsyncpa [#allocation7], 0 }
  0x17   :  { %27 = vsyncpa [#allocation10], 0 }
  0x18   :  { %28 = vsyncpa [#allocation5], 0 }
  0x19   :  { %30 = vsyncpa [#allocation5 + $0x1], 0  ;;  %s4173_s27 = smov 0   ;;  %s4175_s28 = smov 0  }
  0x1a   :  { %s4177_s29 = smov 0   ;;  %s4179_s30 = smov 0  }
  0x1b   :  { %s4181_s0 = smov 0   ;;  %s4183_s19 = smov 0  }
  0x1c   :  { %s4185_s1 = smov 0   ;;  %s4187_s20 = smov 0  }
  0x1d   :  { %s4189_s21 = smov 0   ;;  %s4191_s22 = smov 0  }
  0x1e   :  { %s4193_s2 = smov 0  }
  0x1f LB: > { %5253 = sst [smem:[#allocation33_spill]] %s4008_s28  ;;  %s4229_s23 = sadd.s32 4294967295, %s4044_s2   ;;  %s4044_s2 = sphi %s4193_s2, %s36_s2   ;;  %s4040_s22 = sphi %s4191_s22, %s5351_s22   ;;  %s4036_s21 = sphi %s4189_s21, %s5355_s21   ;;  %s4032_s20 = sphi %s4187_s20, %s5349_s20   ;;  %s4028_s1 = sphi %s4185_s1, %s5354_s1   ;;  %s4024_s19 = sphi %s4183_s19, %s5348_s19   ;;  %s4020_s0 = sphi %s4181_s0, %s5353_s0   ;;  %s4016_s30 = sphi %s4179_s30, %s5352_s30   ;;  %s4012_s29 = sphi %s4177_s29, %s5346_s29   ;;  %s4008_s28 = sphi %s4175_s28, %s5345_s28   ;;  %s4004_s27 = sphi %s4173_s27, %s5344_s27  }
  0x20   : > { %5254 = sst [smem:[#allocation34_spill]] %s4012_s29  ;;  %s2748_s24 = sadd.s32 4294967294, %s4044_s2  }
  0x21   : > { %5255 = sst [smem:[#allocation35_spill]] %s4016_s30  ;;  %s45_s25 = sadd.s32 1, %s4036_s21 }
  0x22   : > { %5256 = sst [smem:[#allocation36_spill]] %s4024_s19  ;;  %s48_s26 = sadd.s32 1, %s4040_s22 }
  0x23   : > { %5257 = sst [smem:[#allocation37_spill]] %s4028_s1  ;;  %p46_p0 = scmp.ge.s32.totalorder %s45_s25, 2 }
  0x24   : > { %5258 = sst [smem:[#allocation38_spill]] %s4032_s20  ;;  %s55_s18 = sadd.s32 1, %s4024_s19 }
  0x25   : > { %5259 = sst [smem:[#allocation39_spill]] %s4040_s22  ;;  %p62_p1 = scmp.ne.s32.totalorder %s4024_s19, %s4020_s0 }
  0x26   : > { %p63_p2 = scmp.eq.s32.totalorder %s4044_s2, 0  ;;  %s5357_s25 = smov (%p46_p0, %s45_s25), 0 }
  0x27   : > { %5260 = sst [smem:[#allocation40_spill]] %s5357_s25  ;;  %s5359_s26 = smov (!%p46_p0, %s48_s26), %s4040_s22 }
  0x28   : > { %p4246_p3 = por %p63_p2, %p62_p1  ;;  %p68_p4 = scmp.ne.s32.totalorder %s4020_s0, %s4016_s30 }
  0x29   : > { %p50_p5 = scmp.ge.s32.totalorder %s5359_s26, 2  ;;  %p5204_p6 = scmp.eq.s32.totalorder %s4229_s23, 0 }
  0x2a   : > { %s141_s1 = ssub.s32 %s4036_s21, %s5357_s25  ;;  %s144_s15 = sadd.s32 1, %s4012_s29 }
  0x2b   : > { %s5361_s26 = smov (%p50_p5, %s5359_s26), 0  ;;  %p4263_p7 = por %p5204_p6, %p68_p4 }
  0x2c   : > { %5262 = sst [smem:[#allocation41_spill]] %s5361_s26  ;;  %p142_p8 = scmp.eq.s32.totalorder %s141_s1, 0 }
  0x2d   : > { %s5263_s17 = scalar_select %p4263_p7, 1, 0 }
  0x2e   : > { %s52_s16 = ssub.s32 %s4040_s22, %s5361_s26  ;;  %p151_p9 = scmp.ne.s32.totalorder %s4012_s29, %s4008_s28 }
  0x2f   : > { %5264 = sst [smem:[#allocation42_spill]] %s5263_s17  ;;  %p53_p10 = scmp.eq.s32.totalorder %s52_s16, 0 }
  0x30   : > { %p157_p11 = scmp.ne.s32.totalorder %s4008_s28, %s4004_s27  ;;  %p4281_p12 = por %p151_p9, %p63_p2 }
  0x31   : > { %s4274_s25 = scalar_select %p142_p8, %s4012_s29, %s144_s15  }
  0x32   : > { %s4277_s14 = scalar_select %p53_p10, %s4024_s19, %s55_s18  }
  0x33   : > { %5265 = sst [smem:[#allocation43_spill]] %s4274_s25  ;;  %p4287_p13 = por %p157_p11, %p5204_p6 }
  0x34   : > { %5266 = sst [smem:[#allocation44_spill]] %s4277_s14  ;;  %p509_p0 = scmp.eq.s32.totalorder %s4229_s23, 3 }
  0x35   : > { %s5268_s17 = scalar_select %p4287_p13, 1, 0 }
  0x36   : > { %p515_p5 = scmp.eq.s32.totalorder %s2748_s24, 3  ;;  %p4295_p8 = por %p509_p0, %p62_p1 }
  0x37   : > { %5269 = sst [smem:[#allocation45_spill]] %s5268_s17  ;;  %p3128_p2 = scmp.lt.s32.totalorder %s4044_s2, 4 }
  0x38   : > { %s5270_s15 = scalar_select %p4295_p8, 1, 0 }
  0x39   : > { %p4302_p10 = por %p515_p5, %p68_p4  ;;  %s594_s18 = sand.u32 1, %s4044_s2  }
  0x3a   : > { %5271 = sst [smem:[#allocation46_spill]] %s5270_s15  ;;  %s596_s27 = sand.u32 1, %s4024_s19  }
  0x3b   : > { %s5272_s16 = scalar_select %p4302_p10, 1, 0 }
  0x3c   : > { %s2756_s1 = sshll.u32 %s596_s27, 4  ;;  %s2891_s26 = sshll.u32 %s4040_s22, 8 }
  0x3d   : > { %5273 = sst [smem:[#allocation47_spill]] %s5272_s16  ;;  %s5274_s17 = sld [smem:[#allocation48_spill]] }
  0x3e   : > { %s598_s24 = scalar_lea.vmem [#allocation3], %s2756_s1  ;;  %p4317_p1 = pnand %p3128_p2, %p4246_p3 }
  0x3f   : > { %s605_s30 = sshll.u32 %s598_s24, 4  ;;  %s4324_s27 = sand.u32 1, %s4012_s29   ;;  %s4321_s30 = int_to_ptr.vmem [resolvable:$true] %s605_s30 }
  0x40   : > { %p4328_p4 = pnand %p3128_p2, %p4281_p12  ;;  %s4332_s25 = scalar_lea.sflag [#allocation4], %s594_s18 }
  0x41   : > { %p3374_p3 = pneg %p4317_p1 }
  0x42   : > { %s5276_s14 = scalar_select %p4328_p4, 1, 0 }
  0x43   : > { %s4313_s28 = scalar_lea.hbm %s5274_s17, %s2891_s26  ;;  %s3377_s24 = scalar_lea.hbm %s5274_s17, 512 }
  0x44   : > { %s3372_s26 = scalar_lea.hbm %s4313_s28, 256  ;;  %p3378_p12 = scmp.lt.u32.totalorder %s4313_s28, %s5274_s17 }
  0x45   : > { %p3373_p9 = scmp.ne.s32.totalorder %s4313_s28, %s3372_s26  ;;  %p3379_p5 = scmp.lt.u32.totalorder %s3377_s24, %s3372_s26 }
  0x46   : > { %p3381_p6 = scmp.lt.u32.totalorder %s3372_s26, %s4313_s28 }
  0x47   : > { %p3375_p11 = pnand %p3374_p3, %p3373_p9  ;;  %p3380_p2 = por %p3379_p5, %p3378_p12 }
  0x49   : > { %p3376_p0 = pneg %p3375_p11  ;;  %p3382_p10 = por %p3381_p6, %p3380_p2 }
  0x4b   : > { %p3383_p8 = pnand %p3382_p10, %p3376_p0 }
  0x4d   : > { %3386 = shalt.err (!%p3383_p8)
}
  0x4e   : > { %s3387_s18 = scalar_lea.vmem %s4321_s30, 256  ;;  %s4046_s20 = smov [#allocation3]  }
  0x4f   : > { %p3388_p9 = scmp.ne.s32.totalorder %s4321_s30, %s3387_s18  ;;  %s3392_s1 = sshll.u32 %s4046_s20, 4  ;;  %s3393_s1 = int_to_ptr.vmem [resolvable:$false] %s3392_s1 }
  0x50   : > { %s3394_s22 = scalar_lea.vmem %s3393_s1, 512  ;;  %p3395_p7 = scmp.lt.s32.totalorder %s4321_s30, %s3393_s1 }
  0x51   : > { %p3390_p11 = pnand %p3388_p9, %p3374_p3  ;;  %p3396_p12 = scmp.lt.s32.totalorder %s3394_s22, %s3387_s18 }
  0x53   : > { %p3391_p13 = pneg %p3390_p11  ;;  %p3397_p5 = por %p3396_p12, %p3395_p7 }
  0x55   : > { %p3398_p6 = pnand %p3397_p5, %p3391_p13 }
  0x57   : > { %3401 = shalt.err (!%p3398_p6)
}
  0x58   : > { %s5209_s26 = smov 128   ;;  %s5211_s24 = smov 8  }
  0x59   : > { %3082 = dma.hbm_to_vmem [thread:$0]  (!%p4317_p1), %s4313_s28, 256, %s4321_s30, %s4332_s25, %s5209_s26, %s5209_s26, %s5211_s24  }
  0x5a   : > { %s4364_s3 = sshll.u32 %s4036_s21, 4  ;;  %s618_s18 = scalar_lea.vmem [#allocation11], %s4324_s27 }
  0x5b   : > { %s625_s20 = sshll.u32 %s618_s18, 4  ;;  %s5277_s4 = sld [smem:[#allocation52_spill]]  ;;  %s626_s20 = int_to_ptr.vmem [resolvable:$true] %s625_s20 }
  0x5c   : > { %p4377_p13 = pneg %p4328_p4 }
  0x5e   : > { %s5278_s28 = scalar_select %p4377_p13, 1, 0 }
  0x61   : > { %s4371_s17 = scalar_lea.hbm %s5277_s4, %s4364_s3  ;;  %s3407_s1 = scalar_lea.hbm %s5277_s4, 32 }
  0x62   : > { %s3402_s15 = scalar_lea.hbm %s4371_s17, 16  ;;  %p3408_p1 = scmp.lt.u32.totalorder %s4371_s17, %s5277_s4 }
  0x63   : > { %p3403_p7 = scmp.ne.s32.totalorder %s4371_s17, %s3402_s15  ;;  %p3409_p3 = scmp.lt.u32.totalorder %s3407_s1, %s3402_s15 }
  0x64   : > { %p3411_p2 = scmp.lt.u32.totalorder %s3402_s15, %s4371_s17 }
  0x65   : > { %p3405_p8 = pnand %p4377_p13, %p3403_p7  ;;  %p3410_p0 = por %p3409_p3, %p3408_p1 }
  0x67   : > { %p3406_p10 = pneg %p3405_p8  ;;  %p3412_p9 = por %p3411_p2, %p3410_p0 }
  0x69   : > { %p3413_p11 = pnand %p3412_p9, %p3406_p10 }
  0x6b   : > { %3416 = shalt.err (!%p3413_p11)
}
  0x6c   : > { %s3417_s24 = scalar_lea.vmem %s626_s20, 16  ;;  %s4049_s19 = smov [#allocation11]  }
  0x6d   : > { %p3418_p12 = scmp.ne.s32.totalorder %s626_s20, %s3417_s24  ;;  %s3422_s29 = sshll.u32 %s4049_s19, 4  ;;  %s3423_s29 = int_to_ptr.vmem [resolvable:$false] %s3422_s29 }
  0x6e   : > { %s3424_s30 = scalar_lea.vmem %s3423_s29, 32  ;;  %p3425_p7 = scmp.lt.s32.totalorder %s626_s20, %s3423_s29 }
  0x6f   : > { %p3420_p5 = pnand %p3418_p12, %p4377_p13  ;;  %p3426_p8 = scmp.lt.s32.totalorder %s3424_s30, %s3417_s24 }
  0x71   : > { %p3421_p6 = pneg %p3420_p5  ;;  %p3427_p4 = por %p3426_p8, %p3425_p7 }
  0x73   : > { %p3428_p1 = pnand %p3427_p4, %p3421_p6 }
  0x75   : > { %3431 = shalt.err (!%p3428_p1)
}
  0x76   : > { %p5279_p3 = scmp.ne.s32.totalorder %s5276_s14, 0  ;;  %s5280_s5 = sld [smem:[#allocation53_spill]] }
  0x77   : > { %s635_s29 = scalar_lea.vmem [#allocation12], %s4324_s27  ;;  %s3010_s1 = smul.u32 3072, %s4036_s21 }
  0x78   : > { %3085 = dma.hbm_to_vmem [thread:$0]  (!%p5279_p3), %s4371_s17, 16, %s626_s20, %s4332_s25  }
  0x79   : > { %s642_s24 = sshll.u32 %s635_s29, 4  ;;  %s643_s24 = int_to_ptr.vmem [resolvable:$true] %s642_s24 }
  0x7c   : > { %s4401_s19 = scalar_lea.hbm %s5280_s5, %s4364_s3  ;;  %s3437_s30 = scalar_lea.hbm %s5280_s5, 32 }
  0x7d   : > { %s3432_s22 = scalar_lea.hbm %s4401_s19, 16  ;;  %p3438_p2 = scmp.lt.u32.totalorder %s4401_s19, %s5280_s5 }
  0x7e   : > { %p3433_p4 = scmp.ne.s32.totalorder %s4401_s19, %s3432_s22  ;;  %p3439_p9 = scmp.lt.u32.totalorder %s3437_s30, %s3432_s22 }
  0x7f   : > { %p3441_p12 = scmp.lt.u32.totalorder %s3432_s22, %s4401_s19 }
  0x80   : > { %p3435_p10 = pnand %p3433_p4, %p4377_p13  ;;  %p3440_p11 = por %p3439_p9, %p3438_p2 }
  0x82   : > { %p3436_p0 = pneg %p3435_p10  ;;  %p3442_p5 = por %p3441_p12, %p3440_p11 }
  0x84   : > { %p3443_p6 = pnand %p3442_p5, %p3436_p0 }
  0x86   : > { %3446 = shalt.err (!%p3443_p6)
}
  0x87   : > { %s3447_s29 = scalar_lea.vmem %s643_s24, 16  ;;  %s4050_s18 = smov [#allocation12]  }
  0x88   : > { %p3448_p7 = scmp.ne.s32.totalorder %s643_s24, %s3447_s29  ;;  %s3452_s4 = sshll.u32 %s4050_s18, 4  ;;  %s3453_s4 = int_to_ptr.vmem [resolvable:$false] %s3452_s4 }
  0x89   : > { %s3454_s17 = scalar_lea.vmem %s3453_s4, 32  ;;  %p3455_p4 = scmp.lt.s32.totalorder %s643_s24, %s3453_s4 }
  0x8a   : > { %p3450_p8 = pnand %p3448_p7, %p4377_p13  ;;  %p3456_p10 = scmp.lt.s32.totalorder %s3454_s17, %s3447_s29 }
  0x8c   : > { %p3451_p1 = pneg %p3450_p8  ;;  %p3457_p3 = por %p3456_p10, %p3455_p4 }
  0x8e   : > { %p3458_p2 = pnand %p3457_p3, %p3451_p1 }
  0x90   : > { %3461 = shalt.err (!%p3458_p2)
}
  0x91   : > { %p5281_p9 = scmp.ne.s32.totalorder %s5276_s14, 0  ;;  %s5282_s6 = sld [smem:[#allocation54_spill]] }
  0x92   : > { %s5283_s18 = smul.u32 192, %s4324_s27 }
  0x93   : > { %3088 = dma.hbm_to_vmem [thread:$0]  (!%p5281_p9), %s4401_s19, 16, %s643_s24, %s4332_s25  }
  0x94   : > { %s653_s4 = scalar_lea.vmem [#allocation13], %s5283_s18 }
  0x95   : > { %s660_s26 = sshll.u32 %s653_s4, 4  ;;  %s4431_s26 = int_to_ptr.vmem [resolvable:$true] %s660_s26 }
  0x97   : > { %s4427_s30 = scalar_lea.hbm %s5282_s6, %s3010_s1  ;;  %s3467_s29 = scalar_lea.hbm %s5282_s6, 6144 }
  0x98   : > { %s3462_s15 = scalar_lea.hbm %s4427_s30, 3072  ;;  %p3468_p12 = scmp.lt.u32.totalorder %s4427_s30, %s5282_s6 }
  0x99   : > { %p3463_p3 = scmp.ne.s32.totalorder %s4427_s30, %s3462_s15  ;;  %p3469_p5 = scmp.lt.u32.totalorder %s3467_s29, %s3462_s15 }
  0x9a   : > { %p3471_p7 = scmp.lt.u32.totalorder %s3462_s15, %s4427_s30 }
  0x9b   : > { %p3465_p0 = pnand %p3463_p3, %p4377_p13  ;;  %p3470_p6 = por %p3469_p5, %p3468_p12 }
  0x9d   : > { %p3466_p11 = pneg %p3465_p0  ;;  %p3472_p8 = por %p3471_p7, %p3470_p6 }
  0x9f   : > { %p3473_p1 = pnand %p3472_p8, %p3466_p11 }
  0xa1   : > { %3476 = shalt.err (!%p3473_p1)
}
  0xa2   : > { %s3477_s22 = scalar_lea.vmem %s4431_s26, 3072  ;;  %s4051_s20 = smov [#allocation13]  }
  0xa3   : > { %p3478_p4 = scmp.ne.s32.totalorder %s4431_s26, %s3477_s22  ;;  %s3482_s18 = sshll.u32 %s4051_s20, 4  ;;  %s3483_s18 = int_to_ptr.vmem [resolvable:$false] %s3482_s18 }
  0xa4   : > { %s3484_s4 = scalar_lea.vmem %s3483_s18, 6144  ;;  %p3485_p3 = scmp.lt.s32.totalorder %s4431_s26, %s3483_s18 }
  0xa5   : > { %p3480_p10 = pnand %p3478_p4, %p4377_p13  ;;  %p3486_p0 = scmp.lt.s32.totalorder %s3484_s4, %s3477_s22 }
  0xa7   : > { %p3481_p2 = pneg %p3480_p10  ;;  %p3487_p12 = por %p3486_p0, %p3485_p3 }
  0xa9   : > { %p3488_p5 = pnand %p3487_p12, %p3481_p2 }
  0xab   : > { %3491 = shalt.err (!%p3488_p5)
}
  0xac   : > { %s4052_s15 = smov 192   ;;  %s4053_s19 = smov 12  }
  0xad   : > { %3091 = dma.hbm_to_vmem [thread:$0]  (!%p5281_p9), %s4427_s30, 3072, %s4431_s26, %s4332_s25, %s4052_s15, %s4052_s15, %s4053_s19  }
  0xae   : > { %s3011_s24 = smul.u32 3, %s4324_s27  ;;  %s2763_s1 = sshll.u32 %s4324_s27, 6 }
  0xaf   : > { %s3012_s29 = smul.u32 48, %s4036_s21  ;;  %s5284_s7 = sld [smem:[#allocation55_spill]] }
  0xb0   : > { %s674_s18 = scalar_lea.vmem [#allocation14], %s3011_s24 }
  0xb1   : > { %s682_s4 = sshll.u32 %s674_s18, 4  ;;  %s683_s4 = int_to_ptr.vmem [resolvable:$true] %s682_s4 }
  0xb5   : > { %s4461_s20 = scalar_lea.hbm %s5284_s7, %s3012_s29  ;;  %s3497_s15 = scalar_lea.hbm %s5284_s7, 96 }
  0xb6   : > { %s3492_s5 = scalar_lea.hbm %s4461_s20, 48  ;;  %p3498_p8 = scmp.lt.u32.totalorder %s4461_s20, %s5284_s7 }
  0xb7   : > { %p3493_p11 = scmp.ne.s32.totalorder %s4461_s20, %s3492_s5  ;;  %p3499_p1 = scmp.lt.u32.totalorder %s3497_s15, %s3492_s5 }
  0xb8   : > { %p3501_p10 = scmp.lt.u32.totalorder %s3492_s5, %s4461_s20 }
  0xb9   : > { %p3495_p6 = pnand %p3493_p11, %p4377_p13  ;;  %p3500_p4 = por %p3499_p1, %p3498_p8 }
  0xbb   : > { %p3496_p7 = pneg %p3495_p6  ;;  %p3502_p2 = por %p3501_p10, %p3500_p4 }
  0xbd   : > { %p3503_p3 = pnand %p3502_p2, %p3496_p7 }
  0xbf   : > { %3506 = shalt.err (!%p3503_p3)
}
  0xc0   : > { %s3507_s24 = scalar_lea.vmem %s683_s4, 48  ;;  %s4054_s29 = smov [#allocation14]  }
  0xc1   : > { %p3508_p0 = scmp.ne.s32.totalorder %s683_s4, %s3507_s24  ;;  %s3512_s22 = sshll.u32 %s4054_s29, 4  ;;  %s3513_s22 = int_to_ptr.vmem [resolvable:$false] %s3512_s22 }
  0xc2   : > { %s3514_s18 = scalar_lea.vmem %s3513_s22, 96  ;;  %p3515_p11 = scmp.lt.s32.totalorder %s683_s4, %s3513_s22 }
  0xc3   : > { %p3510_p12 = pnand %p3508_p0, %p4377_p13  ;;  %p3516_p6 = scmp.lt.s32.totalorder %s3514_s18, %s3507_s24 }
  0xc5   : > { %p3511_p5 = pneg %p3510_p12  ;;  %p3517_p9 = por %p3516_p6, %p3515_p11 }
  0xc7   : > { %p3518_p1 = pnand %p3517_p9, %p3511_p5 }
  0xc9   : > { %3521 = shalt.err (!%p3518_p1)
}
  0xca   : > { %p5285_p8 = scmp.ne.s32.totalorder %s5276_s14, 0  ;;  %s2892_s5 = sshll.u32 %s4036_s21, 10 }
  0xcb   : > { %s693_s30 = scalar_lea.vmem [#allocation15], %s2763_s1  ;;  %s5286_s8 = sld [smem:[#allocation56_spill]] }
  0xcc   : > { %3094 = dma.hbm_to_vmem [thread:$0]  (!%p5285_p8), %s4461_s20, 48, %s683_s4, %s4332_s25  }
  0xcd   : > { %s700_s26 = sshll.u32 %s693_s30, 4  ;;  %s4489_s26 = int_to_ptr.vmem [resolvable:$true] %s700_s26 }
  0xd1   : > { %s4487_s17 = scalar_lea.hbm %s5286_s8, %s2892_s5  ;;  %s3527_s1 = scalar_lea.hbm %s5286_s8, 2048 }
  0xd2   : > { %s3522_s24 = scalar_lea.hbm %s4487_s17, 1024  ;;  %p3528_p10 = scmp.lt.u32.totalorder %s4487_s17, %s5286_s8 }
  0xd3   : > { %p3523_p9 = scmp.ne.s32.totalorder %s4487_s17, %s3522_s24  ;;  %p3529_p2 = scmp.lt.u32.totalorder %s3527_s1, %s3522_s24 }
  0xd4   : > { %p3531_p0 = scmp.lt.u32.totalorder %s3522_s24, %s4487_s17 }
  0xd5   : > { %p3525_p7 = pnand %p3523_p9, %p4377_p13  ;;  %p3530_p3 = por %p3529_p2, %p3528_p10 }
  0xd7   : > { %p3526_p4 = pneg %p3525_p7  ;;  %p3532_p12 = por %p3531_p0, %p3530_p3 }
  0xd9   : > { %p3533_p5 = pnand %p3532_p12, %p3526_p4 }
  0xdb   : > { %3536 = shalt.err (!%p3533_p5)
}
  0xdc   : > { %s3537_s18 = scalar_lea.vmem %s4489_s26, 1024  ;;  %s4055_s5 = smov [#allocation15]  }
  0xdd   : > { %p3538_p11 = scmp.ne.s32.totalorder %s4489_s26, %s3537_s18  ;;  %s3542_s30 = sshll.u32 %s4055_s5, 4  ;;  %s3543_s30 = int_to_ptr.vmem [resolvable:$false] %s3542_s30 }
  0xde   : > { %s3544_s15 = scalar_lea.vmem %s3543_s30, 2048  ;;  %p3545_p9 = scmp.lt.s32.totalorder %s4489_s26, %s3543_s30 }
  0xdf   : > { %p3540_p6 = pnand %p3538_p11, %p4377_p13  ;;  %p3546_p7 = scmp.lt.s32.totalorder %s3544_s15, %s3537_s18 }
  0xe1   : > { %p3541_p1 = pneg %p3540_p6  ;;  %p3547_p10 = por %p3546_p7, %p3545_p9 }
  0xe3   : > { %p3548_p2 = pnand %p3547_p10, %p3541_p1 }
  0xe5   : > { %3551 = shalt.err (!%p3548_p2)
}
  0xe6   : > { %s5218_s19 = smov 64   ;;  %s5221_s24 = smov 4  }
  0xe7   : > { %3097 = dma.hbm_to_vmem [thread:$0]  (!%p5285_p8), %s4487_s17, 1024, %s4489_s26, %s4332_s25, %s5218_s19, %s5218_s19, %s5221_s24  }
  0xe8   : > { %s5287_s9 = sld [smem:[#allocation57_spill]]  ;;  %s713_s29 = scalar_lea.vmem [#allocation16], %s4324_s27 }
  0xe9   : > { %s720_s22 = sshll.u32 %s713_s29, 4  ;;  %s5288_s10 = sld [smem:[#allocation58_spill]]  ;;  %s721_s22 = int_to_ptr.vmem [resolvable:$true] %s720_s22 }
  0xee   : > { %s4520_s1 = scalar_lea.hbm %s5287_s9, %s4364_s3  ;;  %s3557_s20 = scalar_lea.hbm %s5287_s9, 32 }
  0xef   : > { %s4527_s30 = scalar_lea.hbm %s5288_s10, %s4364_s3  ;;  %s3552_s15 = scalar_lea.hbm %s4520_s1, 16 }
  0xf0   : > { %p3553_p4 = scmp.ne.s32.totalorder %s4520_s1, %s3552_s15  ;;  %p3558_p12 = scmp.lt.u32.totalorder %s4520_s1, %s5287_s9 }
  0xf1   : > { %p3559_p5 = scmp.lt.u32.totalorder %s3557_s20, %s3552_s15  ;;  %p3561_p6 = scmp.lt.u32.totalorder %s3552_s15, %s4520_s1 }
  0xf2   : > { %p3555_p3 = pnand %p3553_p4, %p4377_p13 }
  0xf3   : > { %p3560_p11 = por %p3559_p5, %p3558_p12 }
  0xf4   : > { %p3556_p0 = pneg %p3555_p3 }
  0xf5   : > { %p3562_p1 = por %p3561_p6, %p3560_p11 }
  0xf7   : > { %p3563_p9 = pnand %p3562_p1, %p3556_p0 }
  0xf9   : > { %3566 = shalt.err (!%p3563_p9)
}
  0xfa   : > { %s3567_s29 = scalar_lea.vmem %s721_s22, 16  ;;  %s4058_s18 = smov [#allocation16]  }
  0xfb   : > { %p3568_p7 = scmp.ne.s32.totalorder %s721_s22, %s3567_s29  ;;  %s3572_s5 = sshll.u32 %s4058_s18, 4  ;;  %s3573_s5 = int_to_ptr.vmem [resolvable:$false] %s3572_s5 }
  0xfc   : > { %s3574_s26 = scalar_lea.vmem %s3573_s5, 32  ;;  %p3575_p4 = scmp.lt.s32.totalorder %s721_s22, %s3573_s5 }
  0xfd   : > { %p3570_p10 = pnand %p3568_p7, %p4377_p13  ;;  %p3576_p3 = scmp.lt.s32.totalorder %s3574_s26, %s3567_s29 }
  0xff   : > { %p3571_p2 = pneg %p3570_p10  ;;  %p3577_p8 = por %p3576_p3, %p3575_p4 }
 0x101   : > { %p3578_p5 = pnand %p3577_p8, %p3571_p2 }
 0x103   : > { %3581 = shalt.err (!%p3578_p5)
}
 0x104   : > { %p5289_p12 = scmp.ne.s32.totalorder %s5276_s14, 0  ;;  %s730_s19 = scalar_lea.vmem [#allocation17], %s4324_s27 }
 0x105   : > { %s737_s15 = sshll.u32 %s730_s19, 4  ;;  %s5290_s11 = sld [smem:[#allocation59_spill]]  ;;  %s738_s15 = int_to_ptr.vmem [resolvable:$true] %s737_s15 }
 0x106   : > { %3100 = dma.hbm_to_vmem [thread:$0]  (!%p5289_p12), %s4520_s1, 16, %s721_s22, %s4332_s25  }
 0x107   : > { %s3582_s29 = scalar_lea.hbm %s4527_s30, 16  ;;  %s3587_s26 = scalar_lea.hbm %s5288_s10, 32 }
 0x108   : > { %p3583_p8 = scmp.ne.s32.totalorder %s4527_s30, %s3582_s29  ;;  %p3588_p6 = scmp.lt.u32.totalorder %s4527_s30, %s5288_s10 }
 0x109   : > { %p3589_p1 = scmp.lt.u32.totalorder %s3587_s26, %s3582_s29  ;;  %p3591_p7 = scmp.lt.u32.totalorder %s3582_s29, %s4527_s30 }
 0x10a   : > { %p3585_p0 = pnand %p3583_p8, %p4377_p13 }
 0x10b   : > { %s4552_s4 = scalar_lea.hbm %s5290_s11, %s4364_s3  ;;  %p3590_p9 = por %p3589_p1, %p3588_p6 }
 0x10c   : > { %p3586_p11 = pneg %p3585_p0 }
 0x10d   : > { %p3592_p10 = por %p3591_p7, %p3590_p9 }
 0x10f   : > { %p3593_p2 = pnand %p3592_p10, %p3586_p11 }
 0x111   : > { %3596 = shalt.err (!%p3593_p2)
}
 0x112   : > { %s3597_s1 = scalar_lea.vmem %s738_s15, 16  ;;  %s4059_s22 = smov [#allocation17]  }
 0x113   : > { %p3598_p4 = scmp.ne.s32.totalorder %s738_s15, %s3597_s1  ;;  %s3602_s19 = sshll.u32 %s4059_s22, 4  ;;  %s3603_s19 = int_to_ptr.vmem [resolvable:$false] %s3602_s19 }
 0x114   : > { %s3604_s17 = scalar_lea.vmem %s3603_s19, 32  ;;  %p3605_p8 = scmp.lt.s32.totalorder %s738_s15, %s3603_s19 }
 0x115   : > { %p3600_p3 = pnand %p3598_p4, %p4377_p13  ;;  %p3606_p0 = scmp.lt.s32.totalorder %s3604_s17, %s3597_s1 }
 0x117   : > { %p3601_p5 = pneg %p3600_p3  ;;  %p3607_p12 = por %p3606_p0, %p3605_p8 }
 0x119   : > { %p3608_p1 = pnand %p3607_p12, %p3601_p5 }
 0x11b   : > { %3611 = shalt.err (!%p3608_p1)
}
 0x11c   : > { %p5291_p6 = scmp.ne.s32.totalorder %s5276_s14, 0  ;;  %s747_s6 = scalar_lea.vmem [#allocation18], %s4324_s27 }
 0x11d   : > { %s754_s24 = sshll.u32 %s747_s6, 4  ;;  %s5223_s20 = sshll.u32 %s4324_s27, 7  ;;  %s755_s24 = int_to_ptr.vmem [resolvable:$true] %s754_s24 }
 0x11e   : > { %3103 = dma.hbm_to_vmem [thread:$0]  (!%p5291_p6), %s4527_s30, 16, %s738_s15, %s4332_s25  }
 0x11f   : > { %s3612_s29 = scalar_lea.hbm %s4552_s4, 16  ;;  %s3617_s26 = scalar_lea.hbm %s5290_s11, 32 }
 0x120   : > { %p3613_p11 = scmp.ne.s32.totalorder %s4552_s4, %s3612_s29  ;;  %p3618_p7 = scmp.lt.u32.totalorder %s4552_s4, %s5290_s11 }
 0x121   : > { %p3619_p10 = scmp.lt.u32.totalorder %s3617_s26, %s3612_s29  ;;  %p3621_p4 = scmp.lt.u32.totalorder %s3612_s29, %s4552_s4 }
 0x122   : > { %p3615_p12 = pnand %p3613_p11, %p4377_p13 }
 0x123   : > { %p3620_p2 = por %p3619_p10, %p3618_p7 }
 0x124   : > { %p3616_p9 = pneg %p3615_p12 }
 0x125   : > { %p3622_p3 = por %p3621_p4, %p3620_p2 }
 0x127   : > { %p3623_p5 = pnand %p3622_p3, %p3616_p9 }
 0x129   : > { %3626 = shalt.err (!%p3623_p5)
}
 0x12a   : > { %s3627_s30 = scalar_lea.vmem %s755_s24, 16  ;;  %s4060_s15 = smov [#allocation18]  }
 0x12b   : > { %p3628_p8 = scmp.ne.s32.totalorder %s755_s24, %s3627_s30  ;;  %s3632_s19 = sshll.u32 %s4060_s15, 4  ;;  %s3633_s19 = int_to_ptr.vmem [resolvable:$false] %s3632_s19 }
 0x12c   : > { %s3634_s17 = scalar_lea.vmem %s3633_s19, 32  ;;  %p3635_p11 = scmp.lt.s32.totalorder %s755_s24, %s3633_s19 }
 0x12d   : > { %p3630_p0 = pnand %p3628_p8, %p4377_p13  ;;  %p3636_p12 = scmp.lt.s32.totalorder %s3634_s17, %s3627_s30 }
 0x12f   : > { %p3631_p1 = pneg %p3630_p0  ;;  %p3637_p6 = por %p3636_p12, %p3635_p11 }
 0x131   : > { %p3638_p7 = pnand %p3637_p6, %p3631_p1 }
 0x133   : > { %3641 = shalt.err (!%p3638_p7)
}
 0x134   : > { %p5292_p10 = scmp.ne.s32.totalorder %s5276_s14, 0  ;;  %s5224_s6 = sshll.u32 %s4036_s21, 11 }
 0x135   : > { %s765_s29 = scalar_lea.vmem [#allocation19], %s5223_s20  ;;  %s5293_s12 = sld [smem:[#allocation60_spill]] }
 0x136   : > { %3106 = dma.hbm_to_vmem [thread:$0]  (!%p5292_p10), %s4552_s4, 16, %s755_s24, %s4332_s25  }
 0x137   : > { %s772_s18 = sshll.u32 %s765_s29, 4  ;;  %s4602_s18 = int_to_ptr.vmem [resolvable:$true] %s772_s18 }
 0x13b   : > { %s4600_s1 = scalar_lea.hbm %s5293_s12, %s5224_s6  ;;  %s3647_s30 = scalar_lea.hbm %s5293_s12, 4096 }
 0x13c   : > { %s3642_s22 = scalar_lea.hbm %s4600_s1, 2048  ;;  %p3648_p4 = scmp.lt.u32.totalorder %s4600_s1, %s5293_s12 }
 0x13d   : > { %p3643_p6 = scmp.ne.s32.totalorder %s4600_s1, %s3642_s22  ;;  %p3649_p3 = scmp.lt.u32.totalorder %s3647_s30, %s3642_s22 }
 0x13e   : > { %p3651_p8 = scmp.lt.u32.totalorder %s3642_s22, %s4600_s1 }
 0x13f   : > { %p3645_p9 = pnand %p3643_p6, %p4377_p13  ;;  %p3650_p5 = por %p3649_p3, %p3648_p4 }
 0x141   : > { %p3646_p2 = pneg %p3645_p9  ;;  %p3652_p0 = por %p3651_p8, %p3650_p5 }
 0x143   : > { %p3653_p1 = pnand %p3652_p0, %p3646_p2 }
 0x145   : > { %3656 = shalt.err (!%p3653_p1)
}
 0x146   : > { %s3657_s17 = scalar_lea.vmem %s4602_s18, 2048  ;;  %s4061_s29 = smov [#allocation19]  }
 0x147   : > { %p3658_p11 = scmp.ne.s32.totalorder %s4602_s18, %s3657_s17  ;;  %s3662_s5 = sshll.u32 %s4061_s29, 4  ;;  %s3663_s5 = int_to_ptr.vmem [resolvable:$false] %s3662_s5 }
 0x148   : > { %s3664_s26 = scalar_lea.vmem %s3663_s5, 4096  ;;  %p3665_p6 = scmp.lt.s32.totalorder %s4602_s18, %s3663_s5 }
 0x149   : > { %p3660_p12 = pnand %p3658_p11, %p4377_p13  ;;  %p3666_p9 = scmp.lt.s32.totalorder %s3664_s26, %s3657_s17 }
 0x14b   : > { %p3661_p7 = pneg %p3660_p12  ;;  %p3667_p4 = por %p3666_p9, %p3665_p6 }
 0x14d   : > { %p3668_p3 = pnand %p3667_p4, %p3661_p7 }
 0x14f   : > { %3671 = shalt.err (!%p3668_p3)
}
 0x150   : > { %s5294_s22 = smov 8   ;;  %s5295_s4 = smov 128  }
 0x151   : > { %3109 = dma.hbm_to_vmem [thread:$0]  (!%p5292_p10), %s4600_s1, 2048, %s4602_s18, %s4332_s25, %s5295_s4, %s5295_s4, %s5294_s22  }
 0x152   : > { %p2749_p2 = scmp.ge.s32.totalorder %s4044_s2, 1  ;;  %p522_p5 = scmp.lt.s32.totalorder %s4044_s2, 5 }
 0x153   : > { %s2772_s24 = sshll.u32 %s4324_s27, 1  ;;  %s4062_s15 = smov [#allocation6]  }
 0x154   : > { %p4632_p8 = pnand %p2749_p2, %p522_p5  ;;  %s534_s19 = sshll.u32 %s4062_s15, 4  ;;  %s4636_s19 = int_to_ptr.vmem [resolvable:$true] %s534_s19 }
 0x155   : > { %s2894_s17 = sshll.u32 %s4036_s21, 5  ;;  %s5297_s13 = sld [smem:[#allocation61_spill]] }
 0x156   : > { %s5296_s30 = scalar_select %p4632_p8, 1, 0 }
 0x157   : > { %p3063_p0 = pneg %p4632_p8  ;;  %s786_s1 = scalar_lea.vmem [#allocation20], %s2772_s24 }
 0x158   : > { %s794_s26 = sshll.u32 %s786_s1, 4  ;;  %p5298_p1 = scmp.eq.s32.totalorder %s4229_s23, 0  ;;  %s795_s26 = int_to_ptr.vmem [resolvable:$true] %s794_s26 }
 0x15a   : > { %p4648_p11 = pnand %p3063_p0, %p5298_p1 }
 0x15b   : > { %s4644_s18 = scalar_lea.hbm %s5297_s13, %s2894_s17  ;;  %s3677_s5 = scalar_lea.hbm %s5297_s13, 64 }
 0x15c   : > { %s5299_s20 = scalar_select %p4648_p11, 1, 0 }
 0x15d   : > { %s3672_s15 = scalar_lea.hbm %s4644_s18, 32  ;;  %p3678_p9 = scmp.lt.u32.totalorder %s4644_s18, %s5297_s13 }
 0x15e   : > { %p3673_p12 = scmp.ne.s32.totalorder %s4644_s18, %s3672_s15  ;;  %p3679_p4 = scmp.lt.u32.totalorder %s3677_s5, %s3672_s15 }
 0x15f   : > { %p3681_p2 = scmp.lt.u32.totalorder %s3672_s15, %s4644_s18 }
 0x160   : > { %p3675_p7 = pnand %p3673_p12, %p4377_p13  ;;  %p3680_p3 = por %p3679_p4, %p3678_p9 }
 0x162   : > { %p3676_p6 = pneg %p3675_p7  ;;  %p3682_p5 = por %p3681_p2, %p3680_p3 }
 0x164   : > { %p3683_p0 = pnand %p3682_p5, %p3676_p6 }
 0x166   : > { %3686 = shalt.err (!%p3683_p0)
}
 0x167   : > { %s3687_s24 = scalar_lea.vmem %s795_s26, 32  ;;  %s4063_s1 = smov [#allocation20]  }
 0x168   : > { %p3688_p1 = scmp.ne.s32.totalorder %s795_s26, %s3687_s24  ;;  %s3692_s8 = sshll.u32 %s4063_s1, 4  ;;  %s3693_s8 = int_to_ptr.vmem [resolvable:$false] %s3692_s8 }
 0x169   : > { %s3694_s29 = scalar_lea.vmem %s3693_s8, 64  ;;  %p3695_p8 = scmp.lt.s32.totalorder %s795_s26, %s3693_s8 }
 0x16a   : > { %p3690_p12 = pnand %p3688_p1, %p4377_p13  ;;  %p3696_p11 = scmp.lt.s32.totalorder %s3694_s29, %s3687_s24 }
 0x16c   : > { %p3691_p7 = pneg %p3690_p12  ;;  %p3697_p10 = por %p3696_p11, %p3695_p8 }
 0x16e   : > { %p3698_p4 = pnand %p3697_p10, %p3691_p7 }
 0x170   : > { %3701 = shalt.err (!%p3698_p4)
}
 0x171   : > { %p5300_p9 = scmp.ne.s32.totalorder %s5276_s14, 0  ;;  %s5301_s15 = sld [smem:[#allocation49_spill]] }
 0x172   : > { %p5302_p3 = scmp.ne.s32.totalorder %s5299_s20, 0 }
 0x173   : > { %3112 = dma.hbm_to_vmem [thread:$0]  (!%p5300_p9), %s4644_s18, 32, %s795_s26, %s4332_s25  }
 0x174   : > { %p4678_p2 = pneg %p5302_p3 }
 0x177   : > { %s3702_s17 = scalar_lea.hbm %s5301_s15, 1536 }
 0x178   : > { %p3703_p6 = scmp.ne.s32.totalorder %s5301_s15, %s3702_s17  ;;  %p3709_p11 = scmp.lt.u32.totalorder %s3702_s17, %s5301_s15 }
 0x17a   : > { %p3705_p10 = pnand %p4678_p2, %p3703_p6 }
 0x17c   : > { %p3706_p8 = pneg %p3705_p10 }
 0x17e   : > { %p3711_p5 = pnand %p3709_p11, %p3706_p8 }
 0x180   : > { %3714 = shalt.err (!%p3711_p5)
}
 0x181   : > { %s3715_s9 = scalar_lea.vmem %s4636_s19, 1536  ;;  %p3723_p7 = scmp.lt.s32.totalorder %s4636_s19, %s4636_s19 }
 0x182   : > { %p3716_p0 = scmp.ne.s32.totalorder %s4636_s19, %s3715_s9  ;;  %p3724_p4 = scmp.lt.s32.totalorder %s3715_s9, %s3715_s9 }
 0x184   : > { %p3718_p1 = pnand %p3716_p0, %p4678_p2  ;;  %p3725_p6 = por %p3724_p4, %p3723_p7 }
 0x186   : > { %p3719_p12 = pneg %p3718_p1 }
 0x188   : > { %p3726_p10 = pnand %p3725_p6, %p3719_p12 }
 0x18a   : > { %3729 = shalt.err (!%p3726_p10)
}
 0x18b   : > { %s5304_s18 = smov 4   ;;  %s5305_s26 = smov 64  }
 0x18c   : > { %3066 = dma.hbm_to_vmem [thread:$0]  (!%p5302_p3), %s5301_s15, 1536, %s4636_s19, [#allocation7], %s5305_s26, %s5305_s26, %s5304_s18  }
 0x18d   : > { %s4064_s6 = smov [#allocation8]   ;;  %s4065_s5 = smov [#allocation9]  }
 0x18e   : > { %s548_s17 = sshll.u32 %s4064_s6, 4  ;;  %s558_s24 = sshll.u32 %s4065_s5, 4  ;;  %s549_s17 = int_to_ptr.vmem [resolvable:$true] %s548_s17  ;;  %s559_s24 = int_to_ptr.vmem [resolvable:$true] %s558_s24 }
 0x18f   : > { %s5306_s10 = sld [smem:[#allocation50_spill]] }
 0x195   : > { %s3730_s11 = scalar_lea.hbm %s5306_s10, 16 }
 0x196   : > { %p3731_p8 = scmp.ne.s32.totalorder %s5306_s10, %s3730_s11  ;;  %p3737_p0 = scmp.lt.u32.totalorder %s3730_s11, %s5306_s10 }
 0x198   : > { %p3733_p11 = pnand %p3731_p8, %p4678_p2 }
 0x19a   : > { %p3734_p5 = pneg %p3733_p11 }
 0x19c   : > { %p3739_p1 = pnand %p3737_p0, %p3734_p5 }
 0x19e   : > { %3742 = shalt.err (!%p3739_p1)
}
 0x19f   : > { %s3743_s19 = scalar_lea.vmem %s549_s17, 16  ;;  %s3750_s7 = scalar_lea.vmem %s549_s17, 32 }
 0x1a0   : > { %p3744_p12 = scmp.ne.s32.totalorder %s549_s17, %s3743_s19  ;;  %p3751_p6 = scmp.lt.s32.totalorder %s549_s17, %s549_s17 }
 0x1a1   : > { %p3752_p10 = scmp.lt.s32.totalorder %s3750_s7, %s3743_s19 }
 0x1a2   : > { %p3746_p7 = pnand %p3744_p12, %p4678_p2 }
 0x1a3   : > { %p3753_p9 = por %p3752_p10, %p3751_p6 }
 0x1a4   : > { %p3747_p4 = pneg %p3746_p7 }
 0x1a6   : > { %p3754_p13 = pnand %p3753_p9, %p3747_p4 }
 0x1a8   : > { %3757 = shalt.err (!%p3754_p13)
}
 0x1a9   : > { %3069 = dma.hbm_to_vmem [thread:$0]  (!%p5302_p3), %s5306_s10, 16, %s549_s17, [#allocation7]  }
 0x1aa   : > { %s5307_s6 = sld [smem:[#allocation51_spill]] }
 0x1b0   : > { %s3758_s5 = scalar_lea.hbm %s5307_s6, 256 }
 0x1b1   : > { %p3759_p8 = scmp.ne.s32.totalorder %s5307_s6, %s3758_s5  ;;  %p3765_p13 = scmp.lt.u32.totalorder %s3758_s5, %s5307_s6 }
 0x1b3   : > { %p3761_p11 = pnand %p3759_p8, %p4678_p2 }
 0x1b5   : > { %p3762_p9 = pneg %p3761_p11 }
 0x1b7   : > { %p3767_p5 = pnand %p3765_p13, %p3762_p9 }
 0x1b9   : > { %3770 = shalt.err (!%p3767_p5)
}
 0x1ba   : > { %s3771_s7 = scalar_lea.vmem %s559_s24, 256  ;;  %p3779_p7 = scmp.lt.s32.totalorder %s559_s24, %s559_s24 }
 0x1bb   : > { %p3772_p0 = scmp.ne.s32.totalorder %s559_s24, %s3771_s7  ;;  %p3780_p4 = scmp.lt.s32.totalorder %s3771_s7, %s3771_s7 }
 0x1bd   : > { %p3774_p1 = pnand %p3772_p0, %p4678_p2  ;;  %p3781_p6 = por %p3780_p4, %p3779_p7 }
 0x1bf   : > { %p3775_p12 = pneg %p3774_p1 }
 0x1c1   : > { %p3782_p10 = pnand %p3781_p6, %p3775_p12 }
 0x1c3   : > { %3785 = shalt.err (!%p3782_p10)
}
 0x1c4   : > { %3072 = dma.hbm_to_vmem [thread:$0]  (!%p5302_p3), %s5307_s6, 256, %s559_s24, [#allocation10], %s5295_s4, %s5295_s4, %s5294_s22  }
 0x1c5   : > { %s5308_s13 = sshll.u32 %s4036_s21, 11  ;;  %s5309_s5 = sld [smem:[#allocation62_spill]] }
 0x1c6   : > { %s5310_s9 = sshll.u32 %s4324_s27, 7  ;;  %p5311_p11 = scmp.ne.s32.totalorder %s5278_s28, 0 }
 0x1c7   : > { %s805_s29 = scalar_lea.vmem [#allocation21], %s5310_s9 }
 0x1c8   : > { %s812_s19 = sshll.u32 %s805_s29, 4  ;;  %s4750_s19 = int_to_ptr.vmem [resolvable:$true] %s812_s19 }
 0x1cb   : > { %s4746_s1 = scalar_lea.hbm %s5309_s5, %s5308_s13  ;;  %s3791_s24 = scalar_lea.hbm %s5309_s5, 4096 }
 0x1cc   : > { %s3786_s7 = scalar_lea.hbm %s4746_s1, 2048  ;;  %p3792_p5 = scmp.lt.u32.totalorder %s4746_s1, %s5309_s5 }
 0x1cd   : > { %p3787_p8 = scmp.ne.s32.totalorder %s4746_s1, %s3786_s7  ;;  %p3793_p0 = scmp.lt.u32.totalorder %s3791_s24, %s3786_s7 }
 0x1ce   : > { %p3795_p12 = scmp.lt.u32.totalorder %s3786_s7, %s4746_s1 }
 0x1cf   : > { %p3789_p9 = pnand %p3787_p8, %p5311_p11  ;;  %p3794_p1 = por %p3793_p0, %p3792_p5 }
 0x1d1   : > { %p3790_p13 = pneg %p3789_p9  ;;  %p3796_p7 = por %p3795_p12, %p3794_p1 }
 0x1d3   : > { %p3797_p4 = pnand %p3796_p7, %p3790_p13 }
 0x1d5   : > { %3800 = shalt.err (!%p3797_p4)
}
 0x1d6   : > { %s3801_s13 = scalar_lea.vmem %s4750_s19, 2048  ;;  %s4066_s11 = smov [#allocation21]  }
 0x1d7   : > { %p3802_p6 = scmp.ne.s32.totalorder %s4750_s19, %s3801_s13  ;;  %s3806_s16 = sshll.u32 %s4066_s11, 4  ;;  %s3807_s16 = int_to_ptr.vmem [resolvable:$false] %s3806_s16 }
 0x1d8   : > { %s3808_s9 = scalar_lea.vmem %s3807_s16, 4096  ;;  %p3809_p9 = scmp.lt.s32.totalorder %s4750_s19, %s3807_s16 }
 0x1d9   : > { %p3804_p10 = pnand %p3802_p6, %p5311_p11  ;;  %p3810_p3 = scmp.lt.s32.totalorder %s3808_s9, %s3801_s13 }
 0x1db   : > { %p3805_p8 = pneg %p3804_p10  ;;  %p3811_p5 = por %p3810_p3, %p3809_p9 }
 0x1dd   : > { %p3812_p0 = pnand %p3811_p5, %p3805_p8 }
 0x1df   : > { %3815 = shalt.err (!%p3812_p0)
}
 0x1e0   : > { %p5312_p13 = scmp.ne.s32.totalorder %s5276_s14, 0  ;;  %s4067_s29 = smov [#allocation23]  }
 0x1e1   : > { %s572_s7 = sshll.u32 %s4067_s29, 4  ;;  %s4068_s22 = smov [#allocation24]   ;;  %s573_s7 = int_to_ptr.vmem [resolvable:$true] %s572_s7 }
 0x1e2   : > { %3115 = dma.hbm_to_vmem [thread:$0]  (!%p5312_p13), %s4746_s1, 2048, %s4750_s19, %s4332_s25, %s5305_s26, %s5305_s26, %s5304_s18  }
 0x1e3   : > { %s583_s4 = sshll.u32 %s4068_s22, 4  ;;  %s5313_s12 = sld [smem:[#allocation64_spill]]  ;;  %s584_s4 = int_to_ptr.vmem [resolvable:$true] %s583_s4 }
 0x1e9   : > { %s3816_s13 = scalar_lea.hbm %s5313_s12, 16 }
 0x1ea   : > { %p3817_p3 = scmp.ne.s32.totalorder %s5313_s12, %s3816_s13  ;;  %p3823_p7 = scmp.lt.u32.totalorder %s3816_s13, %s5313_s12 }
 0x1ec   : > { %p3819_p1 = pnand %p3817_p3, %p4678_p2 }
 0x1ee   : > { %p3820_p12 = pneg %p3819_p1 }
 0x1f0   : > { %p3825_p4 = pnand %p3823_p7, %p3820_p12 }
 0x1f2   : > { %3828 = shalt.err (!%p3825_p4)
}
 0x1f3   : > { %s3829_s18 = scalar_lea.vmem %s573_s7, 16  ;;  %s3836_s26 = scalar_lea.vmem %s573_s7, 32 }
 0x1f4   : > { %p3830_p6 = scmp.ne.s32.totalorder %s573_s7, %s3829_s18  ;;  %p3837_p9 = scmp.lt.s32.totalorder %s573_s7, %s573_s7 }
 0x1f5   : > { %p3838_p5 = scmp.lt.s32.totalorder %s3836_s26, %s3829_s18 }
 0x1f6   : > { %p3832_p10 = pnand %p3830_p6, %p4678_p2 }
 0x1f7   : > { %p3839_p0 = por %p3838_p5, %p3837_p9 }
 0x1f8   : > { %p3833_p8 = pneg %p3832_p10 }
 0x1fa   : > { %p3840_p13 = pnand %p3839_p0, %p3833_p8 }
 0x1fc   : > { %3843 = shalt.err (!%p3840_p13)
}
 0x1fd   : > { %p5314_p3 = scmp.ne.s32.totalorder %s5299_s20, 0  ;;  %s5315_s22 = sld [smem:[#allocation65_spill]] }
 0x1ff   : > { %3075 = dma.hbm_to_vmem [thread:$0]  (!%p5314_p3), %s5313_s12, 16, %s573_s7, [#allocation7]  }
 0x203   : > { %s5316_s24 = smov %s5315_s22  ;;  %s3844_s17 = scalar_lea.hbm %s5315_s22, 16 }
 0x204   : > { %p3845_p1 = scmp.ne.s32.totalorder %s5316_s24, %s3844_s17  ;;  %p3851_p13 = scmp.lt.u32.totalorder %s3844_s17, %s5316_s24 }
 0x206   : > { %p3847_p12 = pnand %p3845_p1, %p4678_p2 }
 0x208   : > { %p3848_p7 = pneg %p3847_p12 }
 0x20a   : > { %p3853_p4 = pnand %p3851_p13, %p3848_p7 }
 0x20c   : > { %3856 = shalt.err (!%p3853_p4)
}
 0x20d   : > { %s3857_s18 = scalar_lea.vmem %s584_s4, 16  ;;  %s3864_s7 = scalar_lea.vmem %s584_s4, 32 }
 0x20e   : > { %p3858_p6 = scmp.ne.s32.totalorder %s584_s4, %s3857_s18  ;;  %p3865_p9 = scmp.lt.s32.totalorder %s584_s4, %s584_s4 }
 0x20f   : > { %p3866_p5 = scmp.lt.s32.totalorder %s3864_s7, %s3857_s18 }
 0x210   : > { %p3860_p10 = pnand %p3858_p6, %p4678_p2 }
 0x211   : > { %p3867_p0 = por %p3866_p5, %p3865_p9 }
 0x212   : > { %p3861_p8 = pneg %p3860_p10 }
 0x214   : > { %p3868_p11 = pnand %p3867_p0, %p3861_p8 }
 0x216   : > { %3871 = shalt.err (!%p3868_p11)
}
 0x217   : > { %3078 = dma.hbm_to_vmem [thread:$0]  (!%p5314_p3), %s5316_s24, 16, %s584_s4, [#allocation10]  }
 0x218   : > { %s5317_s8 = sld [smem:[#allocation63_spill]]  ;;  %s825_s22 = scalar_lea.vmem [#allocation22], %s4324_s27 }
 0x219   : > { %s832_s17 = sshll.u32 %s825_s22, 4  ;;  %p5318_p11 = scmp.ne.s32.totalorder %s5278_s28, 0  ;;  %s833_s17 = int_to_ptr.vmem [resolvable:$true] %s832_s17 }
 0x21e   : > { %s4817_s29 = scalar_lea.hbm %s5317_s8, %s4364_s3  ;;  %s3877_s4 = scalar_lea.hbm %s5317_s8, 32 }
 0x21f   : > { %s3872_s20 = scalar_lea.hbm %s4817_s29, 16  ;;  %p3878_p3 = scmp.lt.u32.totalorder %s4817_s29, %s5317_s8 }
 0x220   : > { %p3873_p2 = scmp.ne.s32.totalorder %s4817_s29, %s3872_s20  ;;  %p3879_p7 = scmp.lt.u32.totalorder %s3877_s4, %s3872_s20 }
 0x221   : > { %p3881_p4 = scmp.lt.u32.totalorder %s3872_s20, %s4817_s29 }
 0x222   : > { %p3875_p1 = pnand %p3873_p2, %p5318_p11  ;;  %p3880_p13 = por %p3879_p7, %p3878_p3 }
 0x224   : > { %p3876_p12 = pneg %p3875_p1  ;;  %p3882_p6 = por %p3881_p4, %p3880_p13 }
 0x226   : > { %p3883_p10 = pnand %p3882_p6, %p3876_p12 }
 0x228   : > { %3886 = shalt.err (!%p3883_p10)
}
 0x229   : > { %s3887_s27 = scalar_lea.vmem %s833_s17, 16  ;;  %s4069_s3 = smov [#allocation22]  }
 0x22a   : > { %p3888_p8 = scmp.ne.s32.totalorder %s833_s17, %s3887_s27  ;;  %s3892_s18 = sshll.u32 %s4069_s3, 4  ;;  %s3893_s18 = int_to_ptr.vmem [resolvable:$false] %s3892_s18 }
 0x22b   : > { %s3894_s7 = scalar_lea.vmem %s3893_s18, 32  ;;  %p3895_p0 = scmp.lt.s32.totalorder %s833_s17, %s3893_s18 }
 0x22c   : > { %p3890_p9 = pnand %p3888_p8, %p5318_p11  ;;  %p3896_p2 = scmp.lt.s32.totalorder %s3894_s7, %s3887_s27 }
 0x22e   : > { %p3891_p5 = pneg %p3890_p9  ;;  %p3897_p1 = por %p3896_p2, %p3895_p0 }
 0x230   : > { %p3898_p3 = pnand %p3897_p1, %p3891_p5 }
 0x232   : > { %3901 = shalt.err (!%p3898_p3)
}
 0x233   : > { %p5319_p7 = scmp.ne.s32.totalorder %s5276_s14, 0  ;;  %p5320_p12 = scmp.ne.s32.totalorder %s5296_s30, 0 }
 0x234   : > { %s5321_s28 = sld [smem:[#allocation42_spill]] (!%p5320_p12)  ;;  %s843_s26 = sand.u32 (!%p5320_p12), 1, %s4229_s23  }
 0x235   : > { %3118 = dma.hbm_to_vmem [thread:$0]  (!%p5319_p7), %s4817_s29, 16, %s833_s17, %s4332_s25  }
 0x236   : > { %841 = sbr.rel (%p5320_p12) target bundleno = 4184 (0x1058), region = 92  ;;  %s845_s1 = sand.u32 (!%p5320_p12), 1, %s4020_s0  }
 0x237   : > { %s4844_s19 = sshll.u32 (!%p5320_p12), %s845_s1, 4  ;;  %s844_s5 = scalar_lea.sflag (!%p5320_p12), [#allocation4], %s843_s26 }
 0x238   : > { %s847_s22 = scalar_lea.vmem (!%p5320_p12), [#allocation3], %s4844_s19 }
 0x23a   : > { %p5322_p11 = scmp.ne.s32.totalorder (!%p5320_p12), %s5321_s28, 0 }
 0x23d   : > { %3975 = dma.done.wait (%p5322_p11), %s844_s5, 256  }
 0x23e   : > { %3977 = vsyncadd (%p5322_p11), %s844_s5, 4294967040  ;;  %p5323_p13 = scmp.eq.s32.totalorder %s4229_s23, 0 }
 0x240   : > { %3979 = dma.done.wait (%p5323_p13), [#allocation7], 1552   ;;  %p5324_p4 = pmov %p5323_p13 }
 0x242   : > { %3981 = vsyncadd (%p5324_p4), [#allocation7], 4294965744  ;;  %p5325_p6 = pmov %p5324_p4 }
 0x243   : > { %p5326_p10 = pmov %p5324_p4 }
 0x244   : > { %3983 = dma.done.wait (%p5325_p6), [#allocation10], 256  }
 0x245   : > { %3985 = vsyncadd (%p5326_p10), [#allocation10], 4294967040  ;;  %s5327_s14 = sld [smem:[#allocation33_spill]]  ;;  %s5328_s25 = sld [smem:[#allocation45_spill]] }
 0x24b   : > { %s4860_s30 = sand.u32 1, %s5327_s14   ;;  %p5329_p8 = scmp.ne.s32.totalorder %s5328_s25, 0 }
 0x24c   : > { %s867_s29 = scalar_lea.vmem [#allocation11], %s4860_s30 }
 0x24d   : > { %3987 = dma.done.wait (%p5329_p8), %s844_s5, 8368  }
 0x24e   : > { %3989 = vsyncadd (%p5329_p8), %s844_s5, 4294958928  ;;  %s3013_s17 = smul.u32 192, %s4860_s30  ;;  %s2784_s13 = sshll.u32 %s4860_s30, 6 }
 0x24f   : > { %s3014_s20 = smul.u32 3, %s4860_s30  ;;  %s2785_s11 = sshll.u32 %s4860_s30, 7 }
 0x250   : > { %s2786_s4 = sshll.u32 %s4860_s30, 1  ;;  %s875_s16 = scalar_lea.vmem [#allocation12], %s4860_s30 }
 0x251   : > { %s4873_s9 = scalar_lea.vmem [#allocation13], %s3013_s17  ;;  %s4875_s27 = scalar_lea.vmem [#allocation14], %s3014_s20 }
 0x252   : > { %s4877_s3 = scalar_lea.vmem [#allocation15], %s2784_s13  ;;  %s910_s18 = scalar_lea.vmem [#allocation16], %s4860_s30 }
 0x253   : > { %s918_s7 = scalar_lea.vmem [#allocation17], %s4860_s30  ;;  %s926_s28 = scalar_lea.vmem [#allocation18], %s4860_s30 }
 0x254   : > { %s4882_s26 = scalar_lea.vmem [#allocation19], %s2785_s11  ;;  %s4884_s5 = scalar_lea.vmem [#allocation20], %s2786_s4 }
 0x255   : > { %s4886_s14 = scalar_lea.vmem [#allocation21], %s2785_s11  ;;  %s961_s25 = scalar_lea.vmem [#allocation22], %s4860_s30 }
 0x256   : > { %p5330_p9 = pmov %p5324_p4 }
 0x257   : > { %p5331_p5 = pmov %p5324_p4 }
 0x258   : > { %3991 = dma.done.wait (%p5330_p9), [#allocation7], 16  }
 0x259   : > { %3993 = vsyncadd (%p5331_p5), [#allocation7], 4294967280  ;;  %p5332_p0 = pmov %p5324_p4 }
 0x25b   : > { %3995 = dma.done.wait (%p5332_p0), [#allocation10], 16   ;;  %p5333_p2 = pmov %p5332_p0 }
 0x25c   : > { %s4898_s17 = scalar_lea.vmem [#allocation25], %s4844_s19  ;;  %s5334_s20 = sld [smem:[#allocation37_spill]] }
 0x25d   : > { %3997 = vsyncadd (%p5333_p2), [#allocation10], 4294967280 }
 0x262   : > { %p2791_p1 = scmp.ne.s32.totalorder %s5334_s20, 0 }
 0x263   : > { %v3241_v0 = vld [vmem:[#allocation6] sm:$0xff] (!%p2791_p1)   ;;  %v4070_v1 = vmov (!%p2791_p1), 0   ;;  %v3242_v2 = vld [vmem:[#allocation6 + $0x8] sm:$0xff] (!%p2791_p1)   ;;  %v3243_v3 = vld [vmem:[#allocation6 + $0x10] sm:$0xff] (!%p2791_p1)   ;;  %vm1188_vm0 = vcmask (!%p2791_p1), 523264  }
 0x264   : > { %1080 = sbr.rel (%p2791_p1) target bundleno = 879 (0x36f), region = 168  ;;  %1192 = vmatprep.subr.bf16.mxu0 (!%p2791_p1), %v4070_v1  ;;  %v3244_v4 = vld [vmem:[#allocation6 + $0x18] sm:$0xff] (!%p2791_p1)   ;;  %v3245_v6 = vld [vmem:[#allocation6 + $0x20] sm:$0xff] (!%p2791_p1)   ;;  %v3246_v7 = vld [vmem:[#allocation6 + $0x28] sm:$0xff] (!%p2791_p1)  }
 0x265   : > { %1193 = vmatpush1.bf16.msra.mxu0 (!%p2791_p1), %v3241_v0  ;;  %v3255_v5 = vld [vmem:[%s847_s22 + $0x4] ss:$8 sps:$4 sm:$0xff] (!%p2791_p1)   ;;  %v3253_v14 = vld [vmem:[%s847_s22] ss:$8 sps:$4 sm:$0xff] (!%p2791_p1)  }
 0x266   : > { %1194 = vmatprep.subr.bf16.mxu0 (!%p2791_p1), %v4070_v1  ;;  %2806 = vmatprep.mubr.msk.bf16.mxu0 (!%p2791_p1), %vm1188_vm0, %v3255_v5  ;;  %v3247_v8 = vld [vmem:[#allocation6 + $0x30] sm:$0xff] (!%p2791_p1)   ;;  %v3248_v9 = vld [vmem:[#allocation6 + $0x38] sm:$0xff] (!%p2791_p1)   ;;  %v3249_v10 = vld [vmem:[#allocation6 + $0x40] sm:$0xff] (!%p2791_p1)  }
 0x267   : > { %v3250_v11 = vld [vmem:[#allocation6 + $0x48] sm:$0xff] (!%p2791_p1)   ;;  %v3251_v12 = vld [vmem:[#allocation6 + $0x50] sm:$0xff] (!%p2791_p1)   ;;  %v3252_v13 = vld [vmem:[#allocation6 + $0x58] sm:$0xff] (!%p2791_p1)  }
 0x268   : > { %v2807_v15 = vld [vmem:[#allocation8] ss:$0 sm:$0xff] (!%p2791_p1)  ;;  %v1242_v17 = vld [vmem:[#allocation9] sm:$0xff] (!%p2791_p1)  ;;  %v1243_v21 = vld [vmem:[#allocation9 + $0x8] sm:$0xff] (!%p2791_p1) }
 0x269   : > { %1195 = vmatpush1.bf16.msra.mxu0 (!%p2791_p1), %v3242_v2 }
 0x26a   : > { %1196 = vmatprep.subr.bf16.mxu0 (!%p2791_p1), %v4070_v1 }
 0x26d   : > { %1197 = vmatpush1.bf16.msra.mxu0 %v3243_v3 }
 0x26e   : > { %1198 = vmatprep.subr.bf16.mxu0 %v4070_v1 }
 0x271   : > { %1199 = vmatpush1.bf16.msra.mxu0 %v3244_v4 }
 0x272   : > { %1200 = vmatprep.subr.bf16.mxu0 %v4070_v1 }
 0x275   : > { %1201 = vmatpush1.bf16.msra.mxu0 %v3245_v6 }
 0x276   : > { %1202 = vmatprep.subr.bf16.mxu0 %v4070_v1 }
 0x279   : > { %1203 = vmatpush1.bf16.msra.mxu0 %v3246_v7 }
 0x27a   : > { %1204 = vmatprep.subr.bf16.mxu0 %v4070_v1 }
 0x27d   : > { %1205 = vmatpush1.bf16.msra.mxu0 %v3247_v8 }
 0x27e   : > { %1206 = vmatprep.subr.bf16.mxu0 %v4070_v1 }
 0x281   : > { %1207 = vmatpush1.bf16.msra.mxu0 %v3248_v9 }
 0x282   : > { %1208 = vmatprep.subr.bf16.mxu0 %v4070_v1 }
 0x285   : > { %1209 = vmatpush1.bf16.msra.mxu0 %v3249_v10 }
 0x286   : > { %1210 = vmatprep.subr.bf16.mxu0 %v4070_v1 }
 0x289   : > { %1211 = vmatpush1.bf16.msra.mxu0 %v3250_v11 }
 0x28a   : > { %1212 = vmatprep.subr.bf16.mxu0 %v4070_v1 }
 0x28d   : > { %1213 = vmatpush1.bf16.msra.mxu0 %v3251_v12 }
 0x28e   : > { %1214 = vmatprep.subr.bf16.mxu0 %v4070_v1 }
 0x291   : > { %1215 = vmatpush1.bf16.msra.mxu0 %v3252_v13 }
 0x294   : > { %1225 = vmatmul.mubr.bf16.vlgmr.msra.gmra.mrb[0].mxu0 %v3253_v14 }
 0x367   : > { %v1226_v16 = vpop.f32.mrb[0].mxu0 }
 0x368   : > { %v1240_v18 = vadd.f32 %v2807_v15, %v1226_v16  ;;  %v1228_v19 = vpop.f32.mrb[1].mxu0 }
 0x369   : > { %v1229_v20 = vpop.f32.mrb[2].mxu0 }
 0x36a   : > { %v1244_v22 = vadd.f32 %v1242_v17, %v1240_v18  ;;  %v1241_v23 = vadd.f32 %v2807_v15, %v1229_v20  ;;  %v1231_v24 = vpop.f32.mrb[3].mxu0 }
 0x36c   : > { %1246 = vst [vmem:[%s4898_s17] sm:$0xff] %v1244_v22  ;;  %v1245_v25 = vadd.f32 %v1243_v21, %v1241_v23 }
 0x36e   : > { %1247 = vst [vmem:[%s4898_s17 + $0x8] sm:$0xff] %v1245_v25 }
 0x36f PF: > { %v3256_v28 = vld [vmem:[%s4873_s9 + $0x4] ss:$12 sps:$4 sm:$0xff]   ;;  %v3258_v29 = vld [vmem:[%s4873_s9] ss:$12 sps:$4 sm:$0xff]   ;;  %v4071_v30 = vmov 0.0   ;;  %v4072_v56 = vmov 0   ;;  %v1326_v15 = vlaneseq }
 0x370   : > { %2945 = vmatprep.subr.bf16.mxu1 %v4071_v30  ;;  %v3259_v31 = vld [vmem:[%s4873_s9 + $0x8] ss:$12 sps:$4 sm:$0xff]   ;;  %1469 = vmatprep.subr.bf16.mxu0 %v3256_v28  ;;  %v3262_v41 = vld [vmem:[%s4873_s9 + $0x18] ss:$12 sps:$4 sm:$0xff]   ;;  %v3263_v42 = vld [vmem:[%s4873_s9 + $0x20] ss:$12 sps:$4 sm:$0xff]  }
 0x371   : > { %v3260_v32 = vld [vmem:[%s4873_s9 + $0x1c] ss:$12 sps:$4 sm:$0xff]   ;;  %1470 = vmatpush1.bf16.msra.mxu0 %v3258_v29  ;;  %2946 = vmatpush3.bf16.msra.mxu1 %v3259_v31  ;;  %v3264_v43 = vld [vmem:[%s4873_s9 + $0x34] ss:$12 sps:$4 sm:$0xff]   ;;  %v3267_v45 = vld [vmem:[%s4873_s9 + $0x38] ss:$12 sps:$4 sm:$0xff]  }
 0x372   : > { %1471 = vmatprep.subr.bf16.mxu0 %v3260_v32  ;;  %2947 = vmatprep.subr.bf16.mxu1 %v4071_v30  ;;  %v3266_v44 = vld [vmem:[%s4873_s9 + $0x30] ss:$12 sps:$4 sm:$0xff]   ;;  %v3268_v46 = vld [vmem:[%s4873_s9 + $0x4c] ss:$12 sps:$4 sm:$0xff]   ;;  %v3270_v47 = vld [vmem:[%s4873_s9 + $0x48] ss:$12 sps:$4 sm:$0xff]  }
 0x373   : > { %v4908_v26 = vld [vmem:[%s4898_s17] sm:$0xff]  ;;  %1501 = vmatprep.mubr.bf16.mxu0 %v4072_v56  ;;  %vm4073_vm1 = vmmov 0   ;;  %v2808_v6 = vld [vmem:[%s867_s29] ss:$0 sm:$0xff]  ;;  %v4972_v16 = vshrl.u32 %v1326_v15, 7  ;;  %vm1556_vm2 = vcmask 523264  }
 0x374   : > { %1252 = vadd.xlane.f32.xlu0 %v4908_v26  ;;  %v3271_v48 = vld [vmem:[%s4873_s9 + $0x50] ss:$12 sps:$4 sm:$0xff]   ;;  %v3274_v50 = vld [vmem:[%s4873_s9 + $0x60] ss:$12 sps:$4 sm:$0xff]   ;;  %v3275_v51 = vld [vmem:[%s4873_s9 + $0x68] ss:$12 sps:$4 sm:$0xff]   ;;  %2961 = vmatprep.mubr.msk.bf16.mxu1 %vm4073_vm1, %v4071_v30 }
 0x375   : > { %v4911_v27 = vld [vmem:[%s4898_s17 + $0x8] sm:$0xff]  ;;  %1472 = vmatpush1.bf16.msra.mxu0 %v3262_v41  ;;  %2948 = vmatpush3.bf16.msra.mxu1 %v3263_v42  ;;  %v1328_v17 = vsub.s32 0, %v4972_v16  ;;  %v1336_v18 = vsub.s32 2, %v4972_v16  ;;  %v1332_v20 = vsub.s32 1, %v4972_v16  ;;  %vm1604_vm3 = vcmask 130048   ;;  %s4074_s23 = smov 64  }
 0x376   : > { %2949 = vmatprep.subr.bf16.mxu1 %v4071_v30  ;;  %1473 = vmatprep.subr.bf16.mxu0 %v3264_v43  ;;  %v3272_v49 = vld [vmem:[%s4873_s9 + $0x64] ss:$12 sps:$4 sm:$0xff]   ;;  %v3276_v52 = vld [vmem:[%s4873_s9 + $0x7c] ss:$12 sps:$4 sm:$0xff]   ;;  %v3279_v54 = vld [vmem:[%s4873_s9 + $0x80] ss:$12 sps:$4 sm:$0xff]  }
 0x377   : > { %v3278_v53 = vld [vmem:[%s4873_s9 + $0x78] ss:$12 sps:$4 sm:$0xff]   ;;  %v3280_v55 = vld [vmem:[%s4873_s9 + $0x94] ss:$12 sps:$4 sm:$0xff]   ;;  %v3282_v57 = vld [vmem:[%s4873_s9 + $0x90] ss:$12 sps:$4 sm:$0xff]  }
 0x378   : > { %1254 = vadd.xlane.f32.xlu0 %v4911_v27  ;;  %v3283_v58 = vld [vmem:[%s4873_s9 + $0x98] ss:$12 sps:$4 sm:$0xff]   ;;  %v3286_v60 = vld [vmem:[%s4873_s9 + $0xa8] ss:$12 sps:$4 sm:$0xff]   ;;  %v3287_v61 = vld [vmem:[%s4873_s9 + $0xb0] ss:$12 sps:$4 sm:$0xff]  }
 0x379   : > { %1474 = vmatpush1.bf16.msra.mxu0 %v3266_v44  ;;  %2950 = vmatpush3.bf16.msra.mxu1 %v3267_v45  ;;  %v3284_v59 = vld [vmem:[%s4873_s9 + $0xac] ss:$12 sps:$4 sm:$0xff]   ;;  %v2809_v10 = vld [vmem:[%s875_s16] ss:$0 sm:$0xff]  ;;  %vm1803_vm4 = vcmask 1048064   ;;  %s5335_s19 = sld [smem:[#allocation37_spill]] }
 0x37a   : > { %2951 = vmatprep.subr.bf16.mxu1 %v4071_v30  ;;  %1475 = vmatprep.subr.bf16.mxu0 %v3268_v46  ;;  %v1324_v19 = vld [vmem:[%s4875_s27] sm:$0x7] }
 0x37b   : > { %v1329_v21 = vrot.slane %v1324_v19, %v1328_v17  ;;  %v1337_v22 = vrot.slane %v1324_v19, %v1336_v18  ;;  %v1333_v25 = vrot.slane %v1324_v19, %v1332_v20 }
 0x37d   : > { %1476 = vmatpush1.bf16.msra.mxu0 %v3270_v47  ;;  %2952 = vmatpush3.bf16.msra.mxu1 %v3271_v48 }
 0x37e   : > { %2953 = vmatprep.subr.bf16.mxu1 %v4071_v30  ;;  %1477 = vmatprep.subr.bf16.mxu0 %v3272_v49 }
 0x37f   : > { %p2882_p3 = scmp.ge.s32.totalorder %s5335_s19, 1 }
 0x381   : > { %1478 = vmatpush1.bf16.msra.mxu0 %v3274_v50  ;;  %2954 = vmatpush3.bf16.msra.mxu1 %v3275_v51 }
 0x382   : > { %1479 = vmatprep.subr.bf16.mxu0 %v3276_v52  ;;  %2955 = vmatprep.subr.bf16.mxu1 %v4071_v30 }
 0x385   : > { %1480 = vmatpush1.bf16.msra.mxu0 %v3278_v53  ;;  %2956 = vmatpush3.bf16.msra.mxu1 %v3279_v54 }
 0x386   : > { %1481 = vmatprep.subr.bf16.mxu0 %v3280_v55  ;;  %2957 = vmatprep.subr.bf16.mxu1 %v4071_v30 }
 0x389   : > { %1482 = vmatpush1.bf16.msra.mxu0 %v3282_v57  ;;  %2958 = vmatpush3.bf16.msra.mxu1 %v3283_v58 }
 0x38a   : > { %1483 = vmatprep.subr.bf16.mxu0 %v3284_v59  ;;  %2959 = vmatprep.subr.bf16.mxu1 %v4071_v30 }
 0x38d   : > { %1484 = vmatpush1.bf16.msra.mxu0 %v3286_v60  ;;  %2960 = vmatpush3.bf16.msra.mxu1 %v3287_v61 }
 0x38e   : > { %2965 = vmatprep.subr.bf16.mxu1 %v4071_v30  ;;  %2989 = vmatprep.subr.bf16.mxu0 %v4071_v30 }
 0x401   : > { %v1253_v33 = vpop.xlane.xlu0 %1252 }
 0x402   : > { %v1257_v34 = vmul.f32 0.0078125, %v1253_v33 }
 0x404   : > { %v4922_v35 = vsub.f32 %v4908_v26, %v1257_v34 }
 0x405   : > { %v1255_v36 = vpop.xlane.xlu0 %1254 }
 0x406   : > { %v1258_v37 = vmul.f32 0.0078125, %v1255_v36  ;;  %v1261_v38 = vmul.f32 %v4922_v35, %v4922_v35 }
 0x408   : > { %v4927_v39 = vsub.f32 %v4911_v27, %v1258_v37  ;;  %1263 = vadd.xlane.f32.xlu1 %v1261_v38 }
 0x40a   : > { %v1262_v40 = vmul.f32 %v4927_v39, %v4927_v39 }
 0x40c   : > { %1265 = vadd.xlane.f32.xlu1 %v1262_v40 }
 0x495   : > { %v1264_v62 = vpop.xlane.xlu1 %1263 }
 0x496   : > { %v1267_v63 = vmul.f32 0.0078125, %v1264_v62 }
 0x498   : > { %v1269_v0 = vadd.f32 1e-06, %v1267_v63 }
 0x499   : > { %v1266_v1 = vpop.xlane.xlu1 %1265 }
 0x49a   : > { %3336 = vrsqrt.f32 %v1269_v0  ;;  %v1268_v2 = vmul.f32 0.0078125, %v1266_v1 }
 0x49c   : > { %v1270_v3 = vadd.f32 1e-06, %v1268_v2 }
 0x49e   : > { %3338 = vrsqrt.f32 %v1270_v3 }
 0x4a4   : > { %v3337_v4 = vpop.eup %3336 }
 0x4a5   : > { %v1273_v5 = vmul.f32 %v3337_v4, %v4922_v35 }
 0x4a7   : > { %v1281_v9 = vmul.f32 %v2808_v6, %v1273_v5 }
 0x4a8   : > { %v3339_v7 = vpop.eup %3338 }
 0x4a9   : > { %v1274_v8 = vmul.f32 %v3339_v7, %v4927_v39  ;;  %v1289_v12 = vadd.f32 %v2809_v10, %v1281_v9 }
 0x4ab   : > { %v1282_v11 = vmul.f32 %v2808_v6, %v1274_v8 }
 0x4ad   : > { %v1290_v13 = vadd.f32 %v2809_v10, %v1282_v11 }
 0x4af   : > { %v1291_v14 = vpack.c.bf16 %v1290_v13, %v1289_v12 }
 0x4b1   : > { %1502 = vmatmul.mubr.bf16.vlgmr.msra.gmra.mrb[0].mxu0 %v1291_v14  ;;  %2962 = vmatmul.mubr.bf16.vlgmr.msra.gmra.mrb[0].mxu1 %v1291_v14 }
 0x4b2   : > { %2967 = vmatprep.mubr.msk.bf16.mxu1 %vm4073_vm1, %v4071_v30  ;;  %3005 = vmatprep.mubr.msk.bf16.mxu0 %vm4073_vm1, %v4071_v30 }
 0x584   : > { %v1503_v23 = vpop.f32.mrb[0].mxu0  ;;  %v1546_v24 = vpop.f32.mrb[0].mxu1 }
 0x585   : > { %v1505_v28 = vpop.f32.mrb[1].mxu0  ;;  %v2963_v29 = vpop.f32.mrb[1].mxu1  ;;  %v1504_v33 = vadd.f32 %v1503_v23, %v1329_v21  ;;  %v1547_v34 = vadd.f32 %v1546_v24, %v1337_v22 }
 0x586   : > { %v1507_v31 = vpop.f32.mrb[2].mxu0  ;;  %v1549_v32 = vpop.f32.mrb[2].mxu1  ;;  %v1506_v39 = vadd.f32 %v1505_v28, %v1333_v25 }
 0x587   : > { %v1508_v35 = vadd.f32 %v1507_v31, %v1329_v21  ;;  %v1550_v36 = vadd.f32 %v1549_v32, %v1337_v22  ;;  %v1509_v37 = vpop.f32.mrb[3].mxu0  ;;  %v2964_v38 = vpop.f32.mrb[3].mxu1 }
 0x588   : > { %v1510_v40 = vadd.f32 %v1509_v37, %v1333_v25 }
 0x589   : > { %v1553_v41 = vpack.c.bf16 %v1508_v35, %v1504_v33  ;;  %v4982_v42 = vpack.c.bf16 %v1550_v36, %v1547_v34 }
 0x58a   : > { %v1554_v43 = vpack.c.bf16 %v1510_v40, %v1506_v39 }
 0x58c   : > { %v1561_v44 = vsel %vm1556_vm2, %v1554_v43, 0 }
 0x58d   : > { %2966 = vmatpush3.bf16.xpose.msra.mxu1 %v1561_v44  ;;  %v3289_v44 = vld [vmem:[%s4877_s3 + $0x8] sm:$0xff]  }
 0x58e   : > { %2971 = vmatprep.subr.bf16.mxu1 %v4071_v30 }
 0x594   : > { %2968 = vmatmul.mubr.msk.bf16.vlgmr.msra.gmra.mrb[4].mxu1 %vm1556_vm2, %v1553_v41 }
 0x595   : > { %2972 = vmatpush3.bf16.msra.mxu1 %v4982_v42  ;;  %2973 = vmatprep.mubr.msk.bf16.mxu1 %vm4073_vm1, %v4071_v30 }
 0x596   : > { %2977 = vmatprep.subr.bf16.mxu1 %v4071_v30 }
 0x667   : > { %v1597_v45 = vpop.f32.mrb[4].mxu1 }
 0x668   : > { %v2969_v46 = vpop.f32.mrb[5].mxu1  ;;  %v1605_v47 = vsel %vm1604_vm3, %v1597_v45, -inf }
 0x669   : > { %1606 = vmax.xlane.f32.xlu0 %v1605_v47  ;;  %v1600_v48 = vpop.f32.mrb[6].mxu1  ;;  %v3291_v46 = vld [vmem:[%s4877_s3 + $0x18] sm:$0xff]   ;;  %v3292_v47 = vld [vmem:[%s4877_s3 + $0x20] sm:$0xff]  }
 0x66a   : > { %v2970_v49 = vpop.f32.mrb[7].mxu1  ;;  %v1608_v50 = vsel %vm1604_vm3, %v1600_v48, -inf }
 0x66b   : > { %1609 = vmax.xlane.f32.xlu1 %v1608_v50  ;;  %v3295_v49 = vld [vmem:[%s4877_s3 + $0x38] sm:$0xff]  }
 0x6f6   : > { %v1607_v51 = vpop.xlane.xlu0 %1606 }
 0x6f7   : > { %v1611_v52 = vsub.f32 %v1597_v45, %v1607_v51  ;;  %v3290_v45 = vld [vmem:[%s4877_s3 + $0x10] sm:$0xff]  }
 0x6f8   : > { %v1610_v53 = vpop.xlane.xlu1 %1609 }
 0x6f9   : > { %v1613_v54 = vmul.f32 1.442695, %v1611_v52  ;;  %v1612_v55 = vsub.f32 %v1600_v48, %v1610_v53  ;;  %v3294_v48 = vld [vmem:[%s4877_s3 + $0x30] sm:$0xff]  }
 0x6fb   : > { %3340 = vpow2.f32 %v1613_v54  ;;  %v1615_v57 = vmul.f32 1.442695, %v1612_v55 }
 0x6fd   : > { %3342 = vpow2.f32 %v1615_v57 }
 0x705   : > { %v3341_v58 = vpop.eup %3340 }
 0x706   : > { %v1617_v59 = vsel %vm1604_vm3, %v3341_v58, 0.0 }
 0x707   : > { %v3343_v60 = vpop.eup %3342  ;;  %1618 = vadd.xlane.f32.xlu0 %v1617_v59 }
 0x708   : > { %v1620_v61 = vsel %vm1604_vm3, %v3343_v60, 0.0 }
 0x709   : > { %1621 = vadd.xlane.f32.xlu1 %v1620_v61 }
 0x71a   : > { %1675 = vrot.lane.b32.xlu1 %v1553_v41, %s4074_s23 }
 0x71d   : > { %1678 = vrot.lane.b32.xlu0 %v1554_v43, %s4074_s23 }
 0x794   : > { %v1619_v62 = vpop.xlane.xlu0 %1618 }
 0x795   : > { %3344 = vrcp.f32 %v1619_v62 }
 0x796   : > { %v1622_v63 = vpop.xlane.xlu1 %1621 }
 0x797   : > { %3346 = vrcp.f32 %v1622_v63 }
 0x798   : > { %v1679_v4 = vpop.permute.xlu0 %1678 }
 0x799   : > { %v1684_v6 = vsel %vm1556_vm2, %v1679_v4, 0  ;;  %v3301_v4 = vld [vmem:[%s4882_s26 + $0x14] ss:$8 sps:$4 sm:$0xff]  }
 0x79a   : > { %v1676_v7 = vpop.permute.xlu1 %1675 }
 0x79f   : > { %v3345_v0 = vpop.eup %3344 }
 0x7a0   : > { %v1625_v2 = vmul.f32 %v3345_v0, %v3341_v58  ;;  %v2838_v58 = vld [vmem:[%s910_s18] ss:$0 sm:$0xff] }
 0x7a1   : > { %v3347_v1 = vpop.eup %3346 }
 0x7a2   : > { %v1626_v3 = vmul.f32 %v3347_v1, %v3343_v60 }
 0x7a4   : > { %v1627_v5 = vpack.c.bf16 %v1626_v3, %v1625_v2  ;;  %v3296_v2 = vld [vmem:[%s4882_s26] ss:$8 sps:$4 sm:$0xff]   ;;  %v3298_v3 = vld [vmem:[%s4882_s26 + $0x4] ss:$8 sps:$4 sm:$0xff]  }
 0x7a6   : > { %2974 = vmatmul.mubr.msk.bf16.vlgmr.msra.gmra.mrb[8].mxu1 %vm1604_vm3, %v1627_v5  ;;  %v3299_v5 = vld [vmem:[%s4882_s26 + $0x10] ss:$8 sps:$4 sm:$0xff]  }
 0x7a7   : > { %2978 = vmatpush3.bf16.xpose.msra.mxu1 %v1684_v6  ;;  %2979 = vmatprep.mubr.msk.bf16.mxu1 %vm4073_vm1, %v4071_v30 }
 0x7a8   : > { %2983 = vmatprep.subr.bf16.mxu1 %v4071_v30 }
 0x7ae   : > { %2980 = vmatmul.mubr.msk.bf16.vlgmr.msra.gmra.mrb[12].mxu1 %vm1556_vm2, %v1676_v7 }
 0x7af   : > { %2985 = vmatprep.mubr.msk.bf16.mxu1 %vm4073_vm1, %v4071_v30 }
 0x879   : > { %v1665_v8 = vpop.f32.mrb[8].mxu1 }
 0x87a   : > { %v2975_v9 = vpop.f32.mrb[9].mxu1 }
 0x87b   : > { %v1668_v10 = vpop.f32.mrb[10].mxu1 }
 0x87c   : > { %v1672_v11 = vpack.c.bf16 %v1668_v10, %v1665_v8  ;;  %v2976_v12 = vpop.f32.mrb[11].mxu1 }
 0x87d   : > { %v3304_v12 = vld [vmem:[%s4882_s26 + $0x24] ss:$8 sps:$4 sm:$0xff]  }
 0x87e   : > { %1673 = vst.msk [vmem:[#allocation2] sm:$0xff] %vm1556_vm2, %v1672_v11 }
 0x881   : > { %v1720_v13 = vpop.f32.mrb[12].mxu1 }
 0x882   : > { %v2981_v14 = vpop.f32.mrb[13].mxu1  ;;  %v1727_v15 = vsel %vm1604_vm3, %v1720_v13, -inf }
 0x883   : > { %1728 = vmax.xlane.f32.xlu1 %v1727_v15  ;;  %v1723_v18 = vpop.f32.mrb[14].mxu1  ;;  %v3307_v14 = vld [vmem:[%s4882_s26 + $0x34] ss:$8 sps:$4 sm:$0xff]   ;;  %v3305_v15 = vld [vmem:[%s4882_s26 + $0x30] ss:$8 sps:$4 sm:$0xff]  }
 0x884   : > { %v2982_v19 = vpop.f32.mrb[15].mxu1  ;;  %v1730_v21 = vsel %vm1604_vm3, %v1723_v18, -inf }
 0x885   : > { %1731 = vmax.xlane.f32.xlu0 %v1730_v21  ;;  %v3308_v19 = vld [vmem:[%s4882_s26 + $0x40] ss:$8 sps:$4 sm:$0xff]   ;;  %v3313_v21 = vld [vmem:[%s4882_s26 + $0x54] ss:$8 sps:$4 sm:$0xff]  }
 0x910   : > { %v1729_v22 = vpop.xlane.xlu1 %1728 }
 0x911   : > { %v1733_v23 = vsub.f32 %v1720_v13, %v1729_v22  ;;  %v3302_v13 = vld [vmem:[%s4882_s26 + $0x20] ss:$8 sps:$4 sm:$0xff]   ;;  %v3311_v22 = vld [vmem:[%s4882_s26 + $0x50] ss:$8 sps:$4 sm:$0xff]  }
 0x912   : > { %v1732_v24 = vpop.xlane.xlu0 %1731 }
 0x913   : > { %v1735_v25 = vmul.f32 1.442695, %v1733_v23  ;;  %v1734_v28 = vsub.f32 %v1723_v18, %v1732_v24  ;;  %v3310_v18 = vld [vmem:[%s4882_s26 + $0x44] ss:$8 sps:$4 sm:$0xff]   ;;  %v3314_v24 = vld [vmem:[%s4882_s26 + $0x60] ss:$8 sps:$4 sm:$0xff]  }
 0x914   : > { %v3316_v23 = vld [vmem:[%s4882_s26 + $0x64] ss:$8 sps:$4 sm:$0xff]  }
 0x915   : > { %3348 = vpow2.f32 %v1735_v25  ;;  %v1737_v29 = vmul.f32 1.442695, %v1734_v28  ;;  %v3319_v25 = vld [vmem:[%s4882_s26 + $0x74] ss:$8 sps:$4 sm:$0xff]   ;;  %v3317_v28 = vld [vmem:[%s4882_s26 + $0x70] ss:$8 sps:$4 sm:$0xff]  }
 0x917   : > { %3350 = vpow2.f32 %v1737_v29 }
 0x91f   : > { %v3349_v31 = vpop.eup %3348 }
 0x920   : > { %v1739_v32 = vsel %vm1604_vm3, %v3349_v31, 0.0 }
 0x921   : > { %v3351_v33 = vpop.eup %3350  ;;  %1740 = vadd.xlane.f32.xlu0 %v1739_v32 }
 0x922   : > { %v1742_v34 = vsel %vm1604_vm3, %v3351_v33, 0.0 }
 0x923   : > { %1743 = vadd.xlane.f32.xlu1 %v1742_v34 }
 0x937   : > { %1751 = vrot.lane.b32.xlu0 %v4982_v42, %s4074_s23  ;;  %v3288_v42 = vld [vmem:[%s4877_s3] sm:$0xff]  }
 0x938   : > { %2990 = vmatpush3.bf16.msra.mxu0 %v3288_v42 }
 0x939   : > { %2991 = vmatprep.subr.bf16.mxu0 %v4071_v30 }
 0x93c   : > { %2992 = vmatpush3.bf16.msra.mxu0 %v3289_v44 }
 0x93d   : > { %2993 = vmatprep.subr.bf16.mxu0 %v4071_v30 }
 0x940   : > { %2994 = vmatpush3.bf16.msra.mxu0 %v3290_v45 }
 0x941   : > { %2995 = vmatprep.subr.bf16.mxu0 %v4071_v30 }
 0x944   : > { %2996 = vmatpush3.bf16.msra.mxu0 %v3291_v46 }
 0x945   : > { %2997 = vmatprep.subr.bf16.mxu0 %v4071_v30 }
 0x948   : > { %2998 = vmatpush3.bf16.msra.mxu0 %v3292_v47  ;;  %v3320_v47 = vld [vmem:[%s4886_s14 + $0x40] sm:$0xff]  }
 0x949   : > { %2999 = vmatprep.subr.bf16.mxu0 %v4071_v30 }
 0x9ae   : > { %v1741_v35 = vpop.xlane.xlu0 %1740 }
 0x9af   : > { %3352 = vrcp.f32 %v1741_v35 }
 0x9b0   : > { %v1744_v36 = vpop.xlane.xlu1 %1743 }
 0x9b1   : > { %3354 = vrcp.f32 %v1744_v36 }
 0x9b2   : > { %v1752_v37 = vpop.permute.xlu0 %1751 }
 0x9b3   : > { %2984 = vmatpush3.bf16.msra.mxu1 %v1752_v37  ;;  %v2847_v37 = vld [vmem:[%s918_s7] ss:$0 sm:$0xff] }
 0x9b4   : > { %2069 = vmatprep.subr.bf16.mxu1 %v3298_v3 }
 0x9b9   : > { %v3353_v38 = vpop.eup %3352 }
 0x9ba   : > { %v1747_v40 = vmul.f32 %v3353_v38, %v3349_v31 }
 0x9bb   : > { %v3355_v39 = vpop.eup %3354 }
 0x9bc   : > { %v1748_v41 = vmul.f32 %v3355_v39, %v3351_v33 }
 0x9be   : > { %v1749_v43 = vpack.c.bf16 %v1748_v41, %v1747_v40 }
 0x9c0   : > { %2986 = vmatmul.mubr.msk.bf16.vlgmr.msra.gmra.mrb[16].mxu1 %vm1604_vm3, %v1749_v43  ;;  %v2848_v43 = vld [vmem:[%s926_s28] ss:$0 sm:$0xff] }
 0x9c1   : > { %2101 = vmatprep.mubr.bf16.mxu1 %v4072_v56  ;;  %v3293_v56 = vld [vmem:[%s4877_s3 + $0x28] sm:$0xff]   ;;  %2070 = vmatpush1.bf16.msra.mxu1 %v3296_v2 }
 0x9c2   : > { %3000 = vmatpush3.bf16.msra.mxu0 %v3293_v56  ;;  %2071 = vmatprep.subr.bf16.mxu1 %v3301_v4  ;;  %v3321_v56 = vld [vmem:[%s4886_s14] sm:$0xff]  }
 0x9c3   : > { %3001 = vmatprep.subr.bf16.mxu0 %v4071_v30 }
 0x9c5   : > { %2072 = vmatpush1.bf16.msra.mxu1 %v3299_v5 }
 0x9c6   : > { %3002 = vmatpush3.bf16.msra.mxu0 %v3294_v48  ;;  %2073 = vmatprep.subr.bf16.mxu1 %v3304_v12  ;;  %v3322_v48 = vld [vmem:[%s4886_s14 + $0x48] sm:$0xff]  }
 0x9c7   : > { %3003 = vmatprep.subr.bf16.mxu0 %v4071_v30 }
 0x9c9   : > { %2074 = vmatpush1.bf16.msra.mxu1 %v3302_v13 }
 0x9ca   : > { %3004 = vmatpush3.bf16.msra.mxu0 %v3295_v49  ;;  %2075 = vmatprep.subr.bf16.mxu1 %v3307_v14  ;;  %v3323_v49 = vld [vmem:[%s4886_s14 + $0x8] sm:$0xff]  }
 0x9cb   : > { %2923 = vmatprep.subr.bf16.mxu0 %v3320_v47 }
 0x9cd   : > { %2076 = vmatpush1.bf16.msra.mxu1 %v3305_v15 }
 0x9ce   : > { %2077 = vmatprep.subr.bf16.mxu1 %v3310_v18 }
 0x9d1   : > { %2078 = vmatpush1.bf16.msra.mxu1 %v3308_v19 }
 0x9d2   : > { %2079 = vmatprep.subr.bf16.mxu1 %v3313_v21 }
 0x9d5   : > { %2080 = vmatpush1.bf16.msra.mxu1 %v3311_v22 }
 0x9d6   : > { %2081 = vmatprep.subr.bf16.mxu1 %v3316_v23 }
 0x9d9   : > { %2082 = vmatpush1.bf16.msra.mxu1 %v3314_v24 }
 0x9da   : > { %2083 = vmatprep.subr.bf16.mxu1 %v3319_v25 }
 0x9dd   : > { %2084 = vmatpush1.bf16.msra.mxu1 %v3317_v28 }
 0xa93   : > { %v1791_v50 = vpop.f32.mrb[16].mxu1 }
 0xa94   : > { %v2987_v51 = vpop.f32.mrb[17].mxu1 }
 0xa95   : > { %v1794_v52 = vpop.f32.mrb[18].mxu1  ;;  %v3325_v51 = vld [vmem:[%s4886_s14 + $0x10] sm:$0xff]  }
 0xa96   : > { %v1798_v53 = vpack.c.bf16 %v1794_v52, %v1791_v50  ;;  %v2988_v54 = vpop.f32.mrb[19].mxu1  ;;  %v3324_v50 = vld [vmem:[%s4886_s14 + $0x50] sm:$0xff]   ;;  %v3326_v52 = vld [vmem:[%s4886_s14 + $0x58] sm:$0xff]  }
 0xa97   : > { %v3328_v54 = vld [vmem:[%s4886_s14 + $0x60] sm:$0xff]  }
 0xa98   : > { %1800 = vrot.lane.b32.xlu1 %v1798_v53, %s4074_s23  ;;  %v3327_v53 = vld [vmem:[%s4886_s14 + $0x18] sm:$0xff]  }
 0xb0a   : > { %v1801_v55 = vpop.permute.xlu1 %1800 }
 0xb0b   : > { %1804 = vst.msk [vmem:[#allocation2] sm:$0xff] %vm1803_vm4, %v1801_v55  ;;  %v3329_v55 = vld [vmem:[%s4886_s14 + $0x20] sm:$0xff]  }
 0xb12   : > { %v1805_v57 = vld [vmem:[#allocation2] sm:$0xff] }
 0xb13   : > { %3006 = vmatmul.mubr.bf16.vlgmr.msra.gmra.mrb[4].mxu0 %v1805_v57  ;;  %v3330_v57 = vld [vmem:[%s4886_s14 + $0x68] sm:$0xff]  }
 0xb14   : > { %2924 = vmatpush3.bf16.msra.mxu0 %v3321_v56 }
 0xb15   : > { %2925 = vmatprep.subr.bf16.mxu0 %v3322_v48 }
 0xb18   : > { %2926 = vmatpush3.bf16.msra.mxu0 %v3323_v49 }
 0xb19   : > { %2927 = vmatprep.subr.bf16.mxu0 %v3324_v50  ;;  %v2865_v50 = vld [vmem:[%s961_s25] ss:$0 sm:$0xff] }
 0xb1c   : > { %2928 = vmatpush3.bf16.msra.mxu0 %v3325_v51 }
 0xb1d   : > { %2929 = vmatprep.subr.bf16.mxu0 %v3326_v52 }
 0xb20   : > { %2930 = vmatpush3.bf16.msra.mxu0 %v3327_v53 }
 0xb21   : > { %2931 = vmatprep.subr.bf16.mxu0 %v3328_v54 }
 0xb24   : > { %2932 = vmatpush3.bf16.msra.mxu0 %v3329_v55 }
 0xb25   : > { %2933 = vmatprep.subr.bf16.mxu0 %v3330_v57 }
 0xbe6   : > { %v1911_v30 = vpop.f32.mrb[4].mxu0 }
 0xbe7   : > { %v1912_v59 = vadd.f32 %v2838_v58, %v1911_v30  ;;  %v3007_v60 = vpop.f32.mrb[5].mxu0  ;;  %v3332_v30 = vld [vmem:[%s4886_s14 + $0x70] sm:$0xff]  }
 0xbe8   : > { %v1914_v61 = vpop.f32.mrb[6].mxu0  ;;  %v3334_v60 = vld [vmem:[%s4886_s14 + $0x78] sm:$0xff]  }
 0xbe9   : > { %v5033_v62 = vadd.f32 %v1912_v59, %v4908_v26  ;;  %v1915_v63 = vadd.f32 %v2838_v58, %v1914_v61  ;;  %v3008_v0 = vpop.f32.mrb[7].mxu0  ;;  %v3331_v58 = vld [vmem:[%s4886_s14 + $0x28] sm:$0xff]   ;;  %v3333_v59 = vld [vmem:[%s4886_s14 + $0x30] sm:$0xff]   ;;  %v3335_v61 = vld [vmem:[%s4886_s14 + $0x38] sm:$0xff]  }
 0xbea   : > { %2934 = vmatpush3.bf16.msra.mxu0 %v3331_v58 }
 0xbeb   : > { %v5036_v1 = vadd.f32 %v1915_v63, %v4911_v27  ;;  %1922 = vadd.xlane.f32.xlu1 %v5033_v62  ;;  %2935 = vmatprep.subr.bf16.mxu0 %v3332_v30  ;;  %v1977_v63 = vld [vmem:[%s4884_s5] sm:$0x3] }
 0xbec   : > { %v1982_v0 = vrot.slane %v1977_v63, %v1328_v17  ;;  %v1986_v2 = vrot.slane %v1977_v63, %v1332_v20 }
 0xbed   : > { %1924 = vadd.xlane.f32.xlu0 %v5036_v1 }
 0xbee   : > { %2936 = vmatpush3.bf16.msra.mxu0 %v3333_v59 }
 0xbef   : > { %2937 = vmatprep.subr.bf16.mxu0 %v3334_v60 }
 0xbf2   : > { %2938 = vmatpush3.bf16.msra.mxu0 %v3335_v61 }
 0xc78   : > { %v1923_v26 = vpop.xlane.xlu1 %1922 }
 0xc79   : > { %v1926_v6 = vmul.f32 0.0078125, %v1923_v26 }
 0xc7a   : > { %v1925_v27 = vpop.xlane.xlu0 %1924 }
 0xc7b   : > { %v1928_v7 = vsub.f32 %v5033_v62, %v1926_v6  ;;  %v1927_v8 = vmul.f32 0.0078125, %v1925_v27 }
 0xc7d   : > { %v1929_v9 = vsub.f32 %v5036_v1, %v1927_v8  ;;  %v1930_v10 = vmul.f32 %v1928_v7, %v1928_v7 }
 0xc7f   : > { %1932 = vadd.xlane.f32.xlu0 %v1930_v10  ;;  %v1931_v11 = vmul.f32 %v1929_v9, %v1929_v9 }
 0xc81   : > { %1934 = vadd.xlane.f32.xlu1 %v1931_v11 }
 0xd0c   : > { %v1933_v29 = vpop.xlane.xlu0 %1932 }
 0xd0d   : > { %v1936_v31 = vmul.f32 0.0078125, %v1933_v29 }
 0xd0e   : > { %v1935_v32 = vpop.xlane.xlu1 %1934 }
 0xd0f   : > { %v1938_v33 = vadd.f32 1e-06, %v1936_v31  ;;  %v1937_v34 = vmul.f32 0.0078125, %v1935_v32 }
 0xd11   : > { %3356 = vrsqrt.f32 %v1938_v33  ;;  %v1939_v35 = vadd.f32 1e-06, %v1937_v34 }
 0xd13   : > { %3358 = vrsqrt.f32 %v1939_v35 }
 0xd1b   : > { %v3357_v36 = vpop.eup %3356 }
 0xd1c   : > { %v1942_v38 = vmul.f32 %v3357_v36, %v1928_v7 }
 0xd1d   : > { %v3359_v39 = vpop.eup %3358 }
 0xd1e   : > { %v1943_v40 = vmul.f32 %v3359_v39, %v1929_v9  ;;  %v1950_v41 = vmul.f32 %v2847_v37, %v1942_v38 }
 0xd20   : > { %v1951_v42 = vmul.f32 %v2847_v37, %v1943_v40  ;;  %v1958_v44 = vadd.f32 %v2848_v43, %v1950_v41 }
 0xd22   : > { %v1959_v45 = vadd.f32 %v2848_v43, %v1951_v42 }
 0xd24   : > { %v1960_v46 = vpack.c.bf16 %v1959_v45, %v1958_v44 }
 0xd26   : > { %2102 = vmatmul.mubr.bf16.vlgmr.msra.gmra.mrb[20].mxu1 %v1960_v46 }
 0xdf9   : > { %v2103_v3 = vpop.f32.mrb[20].mxu1 }
 0xdfa   : > { %v2104_v4 = vadd.f32 %v2103_v3, %v1982_v0  ;;  %v2105_v5 = vpop.f32.mrb[21].mxu1 }
 0xdfb   : > { %v2106_v26 = vadd.f32 %v2105_v5, %v1986_v2  ;;  %v2107_v6 = vpop.f32.mrb[22].mxu1 }
 0xdfc   : > { %v2116_v27 = vmul.f32 0.044715, %v2104_v4  ;;  %v2108_v7 = vadd.f32 %v2107_v6, %v1982_v0  ;;  %v2109_v8 = vpop.f32.mrb[23].mxu1  ;;  %v2112_v38 = vmul.f32 0.5, %v2104_v4 }
 0xdfd   : > { %v2117_v9 = vmul.f32 0.044715, %v2106_v26  ;;  %v2110_v10 = vadd.f32 %v2109_v8, %v1986_v2  ;;  %v2113_v41 = vmul.f32 0.5, %v2106_v26 }
 0xdfe   : > { %v2120_v11 = vmul.f32 %v2116_v27, %v2104_v4  ;;  %v2118_v12 = vmul.f32 0.044715, %v2108_v7  ;;  %v2114_v39 = vmul.f32 0.5, %v2108_v7 }
 0xdff   : > { %v2121_v13 = vmul.f32 %v2117_v9, %v2106_v26  ;;  %v2119_v14 = vmul.f32 0.044715, %v2110_v10  ;;  %v2115_v43 = vmul.f32 0.5, %v2110_v10 }
 0xe00   : > { %v2124_v15 = vmul.f32 %v2120_v11, %v2104_v4  ;;  %v2122_v18 = vmul.f32 %v2118_v12, %v2108_v7 }
 0xe01   : > { %v2125_v17 = vmul.f32 %v2121_v13, %v2106_v26  ;;  %v2123_v19 = vmul.f32 %v2119_v14, %v2110_v10 }
 0xe02   : > { %v2128_v16 = vadd.f32 %v2124_v15, %v2104_v4  ;;  %v2126_v20 = vmul.f32 %v2122_v18, %v2108_v7 }
 0xe03   : > { %v2127_v21 = vmul.f32 %v2123_v19, %v2110_v10  ;;  %v2129_v22 = vadd.f32 %v2125_v17, %v2106_v26 }
 0xe04   : > { %v2132_v23 = vmul.f32 0.7978846, %v2128_v16  ;;  %v2130_v24 = vadd.f32 %v2126_v20, %v2108_v7 }
 0xe05   : > { %v2131_v25 = vadd.f32 %v2127_v21, %v2110_v10  ;;  %v2133_v28 = vmul.f32 0.7978846, %v2129_v22 }
 0xe06   : > { %3360 = vtanh.f32 %v2132_v23  ;;  %v2134_v29 = vmul.f32 0.7978846, %v2130_v24 }
 0xe07   : > { %v2135_v31 = vmul.f32 0.7978846, %v2131_v25  ;;  %3362 = vtanh.f32 %v2133_v28 }
 0xe08   : > { %3364 = vtanh.f32 %v2134_v29 }
 0xe09   : > { %3366 = vtanh.f32 %v2135_v31 }
 0xe10   : > { %v3361_v32 = vpop.eup %3360 }
 0xe11   : > { %v3363_v33 = vpop.eup %3362  ;;  %v2140_v34 = vadd.f32 1.0, %v3361_v32 }
 0xe12   : > { %v3365_v35 = vpop.eup %3364  ;;  %v2141_v36 = vadd.f32 1.0, %v3363_v33 }
 0xe13   : > { %v3367_v37 = vpop.eup %3366  ;;  %v2142_v40 = vadd.f32 1.0, %v3365_v35  ;;  %v2144_v44 = vmul.f32 %v2140_v34, %v2112_v38 }
 0xe14   : > { %v2143_v42 = vadd.f32 1.0, %v3367_v37  ;;  %v2145_v46 = vmul.f32 %v2141_v36, %v2113_v41 }
 0xe15   : > { %v2146_v45 = vmul.f32 %v2142_v40, %v2114_v39 }
 0xe16   : > { %v2147_v47 = vmul.f32 %v2143_v42, %v2115_v43 }
 0xe17   : > { %v2148_v56 = vpack.c.bf16 %v2146_v45, %v2144_v44 }
 0xe18   : > { %v2149_v48 = vpack.c.bf16 %v2147_v47, %v2145_v46 }
 0xe1a   : > { %2317 = vmatprep.mubr.bf16.mxu0 %v2149_v48 }
 0xe1b   : > { %2318 = vmatmul.mubr.bf16.vlgmr.msra.gmra.mrb[8].mxu0 %v2148_v56 }
 0xeee   : > { %v2939_v49 = vpop.f32.mrb[8].mxu0 }
 0xeef   : > { %v2940_v51 = vpop.f32.mrb[9].mxu0 }
 0xef0   : > { %v2941_v52 = vadd.f32 %v2940_v51, %v2939_v49  ;;  %v2942_v53 = vpop.f32.mrb[10].mxu0  ;;  %2331 = sbr.rel (%p2882_p3) target bundleno = 3833 (0xef9), region = 172 }
 0xef1   : > { %v2943_v54 = vpop.f32.mrb[11].mxu0 }
 0xef2   : > { %v2320_v55 = vadd.f32 %v2941_v52, %v2865_v50  ;;  %v2944_v57 = vadd.f32 %v2943_v54, %v2942_v53 }
 0xef4   : > { %v2326_v58 = vadd.f32 %v2320_v55, %v5033_v62  ;;  %v2323_v30 = vadd.f32 %v2944_v57, %v2865_v50 }
 0xef6   : > { %v2327_v59 = vadd.f32 %v2323_v30, %v5036_v1  ;;  %2332 = vst [vmem:[%s4898_s17] sm:$0xff] (!%p2882_p3), %v2326_v58 }
 0xef8   : > { %2333 = vst [vmem:[%s4898_s17 + $0x8] sm:$0xff] %v2327_v59 }
 0xef9 PF: > { %s5336_s22 = sld [smem:[#allocation37_spill]] }
 0xeff   : > { %p2883_p7 = scmp.ne.s32.totalorder %s5336_s22, 1 }
 0xf00   : > { %2340 = vadd.xlane.f32.xlu0 (!%p2883_p7), %v2326_v58  ;;  %v2884_v9 = vld [vmem:[#allocation23] ss:$0 sm:$0xff] (!%p2883_p7)  ;;  %v2885_v11 = vld [vmem:[#allocation24] ss:$0 sm:$0xff] (!%p2883_p7) }
 0xf01   : > { %2337 = sbr.rel (%p2883_p7) target bundleno = 4156 (0x103c), region = 176 }
 0xf04   : > { %2342 = vadd.xlane.f32.xlu0 (!%p2883_p7), %v2327_v59 }
 0xf8d   : > { %v2341_v60 = vpop.xlane.xlu0 %2340 }
 0xf8e   : > { %v2344_v61 = vmul.f32 0.0078125, %v2341_v60 }
 0xf90   : > { %v2346_v63 = vsub.f32 %v2326_v58, %v2344_v61 }
 0xf91   : > { %v2343_v62 = vpop.xlane.xlu0 %2342 }
 0xf92   : > { %v2345_v0 = vmul.f32 0.0078125, %v2343_v62  ;;  %v2348_v2 = vmul.f32 %v2346_v63, %v2346_v63 }
 0xf94   : > { %v2347_v1 = vsub.f32 %v2327_v59, %v2345_v0  ;;  %2350 = vadd.xlane.f32.xlu1 %v2348_v2 }
 0xf96   : > { %v2349_v3 = vmul.f32 %v2347_v1, %v2347_v1 }
 0xf98   : > { %2352 = vadd.xlane.f32.xlu1 %v2349_v3 }
0x1021   : > { %v2351_v4 = vpop.xlane.xlu1 %2350 }
0x1022   : > { %v2354_v5 = vmul.f32 0.0078125, %v2351_v4 }
0x1024   : > { %v2356_v26 = vadd.f32 1e-06, %v2354_v5 }
0x1025   : > { %v2353_v6 = vpop.xlane.xlu1 %2352 }
0x1026   : > { %3368 = vrsqrt.f32 %v2356_v26  ;;  %v2355_v27 = vmul.f32 0.0078125, %v2353_v6 }
0x1028   : > { %v2357_v7 = vadd.f32 1e-06, %v2355_v27 }
0x102a   : > { %3370 = vrsqrt.f32 %v2357_v7 }
0x1030   : > { %v3369_v8 = vpop.eup %3368 }
0x1031   : > { %v2360_v10 = vmul.f32 %v3369_v8, %v2346_v63 }
0x1033   : > { %v2368_v12 = vmul.f32 %v2884_v9, %v2360_v10 }
0x1034   : > { %v3371_v13 = vpop.eup %3370 }
0x1035   : > { %v2376_v14 = vadd.f32 %v2885_v11, %v2368_v12  ;;  %v2361_v15 = vmul.f32 %v3371_v13, %v2347_v1 }
0x1037   : > { %2378 = vst [vmem:[%s4898_s17] sm:$0xff] %v2376_v14  ;;  %v2369_v18 = vmul.f32 %v2884_v9, %v2361_v15 }
0x1039   : > { %v2377_v17 = vadd.f32 %v2885_v11, %v2369_v18 }
0x103b   : > { %2379 = vst [vmem:[%s4898_s17 + $0x8] sm:$0xff] %v2377_v17 }
0x103c PF: > { %s5337_s30 = sld [smem:[#allocation38_spill]]  ;;  %s5338_s29 = sld [smem:[#allocation46_spill]] }
0x103d   : > { %s5339_s16 = sld [smem:[#allocation66_spill]]  ;;  %s2394_s27 = sshll.u32 %s4898_s17, 4  ;;  %s5100_s27 = int_to_ptr.vmem [resolvable:$true] %s2394_s27 }
0x103e   : > { %s5104_s3 = scalar_lea.sflag [#allocation5], %s845_s1  ;;  %s3902_s18 = scalar_lea.vmem %s5100_s27, 256 }
0x103f   : > { %p3903_p12 = scmp.ne.s32.totalorder %s5100_s27, %s3902_s18  ;;  %s4075_s7 = smov [#allocation25]  }
0x1040   : > { %s3906_s28 = sshll.u32 %s4075_s7, 4  ;;  %s3907_s28 = int_to_ptr.vmem [resolvable:$false] %s3906_s28 }
0x1041   : > { %s3908_s26 = scalar_lea.vmem %s3907_s28, 512  ;;  %p3909_p6 = scmp.lt.s32.totalorder %s5100_s27, %s3907_s28 }
0x1042   : > { %s2896_s13 = sshll.u32 %s5337_s30, 8  ;;  %p5340_p11 = scmp.ne.s32.totalorder %s5338_s29, 0 }
0x1043   : > { %s5097_s9 = scalar_lea.hbm %s5339_s16, %s2896_s13  ;;  %p3910_p10 = scmp.lt.s32.totalorder %s3908_s26, %s3902_s18 }
0x1044   : > { %p3904_p13 = pnand %p3903_p12, %p5340_p11 }
0x1045   : > { %p3911_p8 = por %p3910_p10, %p3909_p6 }
0x1046   : > { %p3905_p4 = pneg %p3904_p13 }
0x1048   : > { %p3912_p9 = pnand %p3911_p8, %p3905_p4 }
0x104a   : > { %3915 = shalt.err (!%p3912_p9)
}
0x104b   : > { %s3916_s1 = scalar_lea.hbm %s5097_s9, 256  ;;  %s3920_s25 = scalar_lea.hbm %s5339_s16, 512 }
0x104c   : > { %p3917_p5 = scmp.ne.s32.totalorder %s5097_s9, %s3916_s1  ;;  %p3921_p1 = scmp.lt.u32.totalorder %s5097_s9, %s5339_s16 }
0x104d   : > { %p3922_p3 = scmp.lt.u32.totalorder %s3920_s25, %s3916_s1  ;;  %p3924_p12 = scmp.lt.u32.totalorder %s3916_s1, %s5097_s9 }
0x104e   : > { %p3918_p0 = pnand %p3917_p5, %p5340_p11 }
0x104f   : > { %p3923_p7 = por %p3922_p3, %p3921_p1 }
0x1050   : > { %p3919_p2 = pneg %p3918_p0 }
0x1051   : > { %p3925_p13 = por %p3924_p12, %p3923_p7 }
0x1053   : > { %p3926_p4 = pnand %p3925_p13, %p3919_p2 }
0x1055   : > { %3929 = shalt.err (!%p3926_p4)
}
0x1056   : > { %s4076_s23 = smov 128   ;;  %s4077_s19 = smov 8  }
0x1057   : > { %3061 = dma.vmem_to_hbm [thread:$0]  (%p5340_p11), %s5100_s27, 256, %s5097_s9, %s5104_s3, %s4076_s23, %s4076_s23, %s4077_s19  }
0x1058 PF: > { %s5341_s22 = sld [smem:[#allocation35_spill]]  ;;  %s5342_s30 = sld [smem:[#allocation47_spill]] }
0x1059   : > { %p3134_p6 = scmp.ge.s32.totalorder %s4044_s2, 2 }
0x105e   : > { %s2409_s13 = sand.u32 1, %s5341_s22   ;;  %p5343_p10 = scmp.ne.s32.totalorder %s5342_s30, 0 }
0x105f   : > { %s2410_s11 = scalar_lea.sflag [#allocation5], %s2409_s13 }
0x1060   : > { %p3120_p8 = pnand %p3134_p6, %p5343_p10 }
0x1062   : > { %3999 = dma.done.wait (!%p3120_p8), %s2410_s11, 256  }
0x1063   : > { %4001 = vsyncadd (!%p3120_p8), %s2410_s11, 4294967040  ;;  %s36_s2 = sadd.s32 1, %s4044_s2   ;;  %s5344_s27 = sld [smem:[#allocation33_spill]] }
0x1064   : > { %p33_p9 = scmp.ge.s32.totalorder %s36_s2, 6   ;;  %s5345_s28 = sld [smem:[#allocation34_spill]] }
0x1065   : > { %s5346_s29 = sld [smem:[#allocation43_spill]]  ;;  %s5347_s4 = sld [smem:[#allocation36_spill]] }
0x1066   : > { %s5348_s19 = sld [smem:[#allocation44_spill]]  ;;  %s5349_s20 = sld [smem:[#allocation39_spill]] }
0x1067   : > { %s5350_s9 = sld [smem:[#allocation40_spill]]  ;;  %s5351_s22 = sld [smem:[#allocation41_spill]] }
0x1068   : > { %s5352_s30 = smov %s4020_s0  ;;  %s5354_s1 = smov %s4036_s21 }
0x1069   :  { %35 = sbr.rel (!%p33_p9) target bundleno = 31 (0x1f), region = 301 }
0x106b   : > { %s5353_s0 = smov %s5347_s4 }
0x106d   : > { %s5355_s21 = smov %s5350_s9 }
0x1070   :  { %2415 = vsyncpa [#allocation4], 1 }
0x1071   :  { %2417 = vsyncpa [#allocation4 + $0x1], 1 }
0x1072   :  { %2418 = vsyncpa [#allocation7], 1 }
0x1073   :  { %2419 = vsyncpa [#allocation10], 1 }
0x1074   :  { %2420 = vsyncpa [#allocation5], 1 }
0x1075   :  { %2422 = vsyncpa [#allocation5 + $0x1], 1 }

</bundles_post_ra>
